<compile_context>
chip_gen: v6e
topology: v6e:2x2x1
jax: 0.10.0
libtpu: 0.0.40
codegen_flags: <defaults>
</compile_context>

<pallas_src>
import numpy as np
import jax
import jax.numpy as jnp
from jax import lax
from jax.experimental import pallas as pl
from jax.experimental.pallas import tpu as pltpu

LEAKY_SLOPE = 0.01   # torch.nn.LeakyReLU default negative_slope
LANE = 128           # TPU lane width
SUBLANE = 8          # TPU sublane tile


def _round_up(n, m):
    return ((n + m - 1) // m) * m


# ---------------------------------------------------------------------------
# Parameter "glue": fold conv layers into dense matrices (exact, not approx).
# ---------------------------------------------------------------------------
def conv1d_to_dense(W, b, Lin):
    """W: (Cout, Cin, K) torch Conv1d weight -> dense (Cin*Lin, Cout*Lout)."""
    W = np.asarray(W, dtype=np.float32)
    b = np.asarray(b, dtype=np.float32)
    Cout, Cin, K = W.shape
    Lout = Lin - K + 1
    M = np.zeros((Cin * Lin, Cout * Lout), dtype=np.float32)
    for co in range(Cout):
        for ci in range(Cin):
            for k in range(K):
                for t in range(Lout):
                    M[ci * Lin + t + k, co * Lout + t] = W[co, ci, k]
    bias = np.repeat(b, Lout).astype(np.float32)[None, :]
    return M, bias, Lout


def convtr1d_to_dense(W, b, Lin):
    """W: (Cin, Cout, K) torch ConvTranspose1d weight -> (Cin*Lin, Cout*Lout)."""
    W = np.asarray(W, dtype=np.float32)
    b = np.asarray(b, dtype=np.float32)
    Cin, Cout, K = W.shape
    Lout = Lin + K - 1
    M = np.zeros((Cin * Lin, Cout * Lout), dtype=np.float32)
    for ci in range(Cin):
        for co in range(Cout):
            for s in range(Lin):
                for k in range(K):
                    M[ci * Lin + s, co * Lout + s + k] = W[ci, co, k]
    bias = np.repeat(b, Lout).astype(np.float32)[None, :]
    return M, bias, Lout


def _pad_block(M, bias, in_pad, out_pad):
    """Zero-pad a folded weight/bias to lane/sublane-friendly padded shape."""
    Mp = np.zeros((in_pad, out_pad), dtype=np.float32)
    Mp[: M.shape[0], : M.shape[1]] = M
    bp = np.zeros((1, out_pad), dtype=np.float32)
    bp[:, : bias.shape[1]] = bias
    return Mp, bp


def build_dense_layers(enc_convs, final_conv, dec_convs, latent_dim, seq_length):
    """Fold all conv layers to lane-padded dense matmul weights (stored bf16).

    Returns (enc_layers, fused_final, dec_layers, lat_pad) where every weight
    has shape (prev_out_pad, out_pad) with out_pad a multiple of 128, and the
    final encoder layer is the fused [0.5*log_var | mu] matrix (each half
    padded to lat_pad columns so in-kernel slices stay lane-aligned).
    """
    enc_layers = []
    in_pad = _round_up(seq_length, LANE)
    Lcur = seq_length
    for W, b in enc_convs:
        M, bias, Lcur = conv1d_to_dense(W, b, Lcur)
        out_pad = _round_up(M.shape[1], LANE)
        Mp, bp = _pad_block(M, bias, in_pad, out_pad)
        enc_layers.append((jnp.asarray(Mp, jnp.bfloat16),
                           jnp.asarray(bp, jnp.bfloat16)))
        in_pad = out_pad

    Wf, bf = final_conv
    Mfin, bias_fin, Lout = conv1d_to_dense(Wf, bf, Lcur)
    assert Lout == 1
    lat_pad = _round_up(latent_dim, LANE)
    # Head ordering matches BasicCNNVAE.getLatentEncoding exactly:
    #   log_var = enc_out[:, :latent_dim],  mu = enc_out[:, latent_dim:]
    # Fold the 0.5 of exp(0.5*log_var) into the log_var half (exact in bf16).
    M_lv, b_lv = _pad_block(0.5 * Mfin[:, :latent_dim],
                            0.5 * bias_fin[:, :latent_dim], in_pad, lat_pad)
    M_mu, b_mu = _pad_block(Mfin[:, latent_dim:], bias_fin[:, latent_dim:],
                            in_pad, lat_pad)
    fused_final = (
        jnp.asarray(np.concatenate([M_lv, M_mu], axis=1), jnp.bfloat16),
        jnp.asarray(np.concatenate([b_lv, b_mu], axis=1), jnp.bfloat16))

    dec_layers = []
    in_pad = lat_pad
    Lcur = 1
    for W, b in dec_convs:
        M, bias, Lcur = convtr1d_to_dense(W, b, Lcur)
        out_pad = _round_up(M.shape[1], LANE)
        Mp, bp = _pad_block(M, bias, in_pad, out_pad)
        dec_layers.append((jnp.asarray(Mp, jnp.bfloat16),
                           jnp.asarray(bp, jnp.bfloat16)))
        in_pad = out_pad
    assert Lcur == seq_length
    return enc_layers, fused_final, dec_layers, lat_pad


# ---------------------------------------------------------------------------
# Pallas kernel: the whole VAE forward as lane-dense matmuls + elementwise.
# ---------------------------------------------------------------------------
def _make_vae_kernel(n_enc_hidden, n_dec, lat_pad, bias_offsets, bias_widths):
    n_w = n_enc_hidden + 1 + n_dec
    # ref order: x, noise, W_0 .. W_{n_w-1}, bias_slab, out
    def kernel(*refs):
        x_ref, noise_ref = refs[0], refs[1]
        w_refs = refs[2:2 + n_w]
        bias_ref = refs[2 + n_w]
        out_ref = refs[3 + n_w]

        biases = bias_ref[...]  # (1, total_bias) bf16, loaded once

        def bias_of(i):
            off = bias_offsets[i]
            return biases[:, off:off + bias_widths[i]]   # static, lane-aligned

        # Encoder hidden conv layers (folded) + LeakyReLU; activations carried
        # bf16 between layers, LeakyReLU on the f32 MXU accumulate.
        h = x_ref[...].astype(jnp.bfloat16)
        li = 0
        for _ in range(n_enc_hidden):
            a = jnp.dot(h, w_refs[li][...],
                        preferred_element_type=jnp.float32) + bias_of(li)
            h = jnp.where(a > 0, a, LEAKY_SLOPE * a).astype(jnp.bfloat16)
            li += 1

        # Fused final conv: one matmul producing [0.5*log_var | mu] halves,
        # sliced at a lane-aligned boundary.
        enc = jnp.dot(h, w_refs[li][...],
                      preferred_element_type=jnp.float32) + bias_of(li)
        li += 1
        half_log_var = enc[:, :lat_pad]     # 0.5 factor pre-folded into W/b
        mu = enc[:, lat_pad:]
        # Reparameterization (exp -> EUP slot); padded lanes of noise are zero
        # so padded lanes of d stay zero.
        d = (mu + jnp.exp(half_log_var) * noise_ref[...]).astype(jnp.bfloat16)

        # Decoder transpose convs (folded); LeakyReLU on all but the last.
        for i in range(n_dec):
            a = jnp.dot(d, w_refs[li][...],
                        preferred_element_type=jnp.float32) + bias_of(li)
            li += 1
            if i < n_dec - 1:
                d = jnp.where(a > 0, a, LEAKY_SLOPE * a).astype(jnp.bfloat16)
            else:
                d = a
        out_ref[...] = d.astype(out_ref.dtype)

    return kernel


def _choose_batch_tile(B8, cap=512):
    """Minimal #tiles with a <=cap-row tile, then shrink the tile to the padded
    batch / #tiles (multiple of 8) so padding waste is minimal.  B>=256 yields
    TB>=256 automatically (good for the 2x256x256 MXU on v6e/v7x)."""
    n_tiles = -(-B8 // min(B8, cap))
    TB = _round_up(-(-B8 // n_tiles), SUBLANE)
    return TB, n_tiles


def cnn_vae_forward(x, noise, enc_layers, fused_final, dec_layers, lat_pad,
                    seq_length):
    """x: (B, seq_length) f32, noise: (B, latent_dim) f32 -> (B, seq_length)."""
    B, S = x.shape

    w_mats = [W for W, _ in enc_layers] + [fused_final[0]] + \
             [W for W, _ in dec_layers]
    bias_list = [b for _, b in enc_layers] + [fused_final[1]] + \
                [b for _, b in dec_layers]
    bias_widths = [int(b.shape[1]) for b in bias_list]
    bias_offsets = [int(v) for v in np.cumsum([0] + bias_widths[:-1])]
    bias_slab = jnp.concatenate(bias_list, axis=1)   # (1, sum widths) bf16

    in_pad = int(w_mats[0].shape[0])
    out_pad = int(w_mats[-1].shape[1])

    B8 = _round_up(B, SUBLANE)
    TB, n_tiles = _choose_batch_tile(B8)
    B_pad = TB * n_tiles

    x_pad = jnp.zeros((B_pad, in_pad), jnp.float32).at[:B, :S].set(x)
    noise_pad = jnp.zeros((B_pad, lat_pad), jnp.float32).at[
        :B, : noise.shape[1]].set(noise)

    kernel = _make_vae_kernel(len(enc_layers), len(dec_layers), lat_pad,
                              bias_offsets, bias_widths)

    def batch_spec(cols):
        return pl.BlockSpec((TB, cols), lambda i: (i, 0))

    def build_call(single_buffer_weights):
        def resident_spec(arr):
            # Same block index every grid step -> DMA'd once, VMEM-resident.
            if single_buffer_weights:
                # Constant-index input: one buffer is enough (halves weight VMEM).
                return pl.BlockSpec(arr.shape, lambda i: (0, 0),
                                    pipeline_mode=pl.Buffered(1))
            return pl.BlockSpec(arr.shape, lambda i: (0, 0))

        in_specs = ([batch_spec(in_pad), batch_spec(lat_pad)]
                    + [resident_spec(w) for w in w_mats]
                    + [resident_spec(bias_slab)])
        out_specs = batch_spec(out_pad)

        # Explicit scoped-VMEM budget: bf16 weights (+bias slab), double-buffered
        # f32 I/O tiles, and a margin for in-kernel f32 temporaries.
        w_buf = 1 if single_buffer_weights else 2
        weight_bytes = (sum(int(np.prod(w.shape)) for w in w_mats)
                        + int(np.prod(bias_slab.shape))) * 2 * w_buf
        io_bytes = 2 * TB * (in_pad + lat_pad + out_pad) * 4
        tmp_bytes = 4 * TB * max(int(w.shape[1]) for w in w_mats) * 4
        vmem_limit = int(min(64 << 20,
                             max(8 << 20,
                                 weight_bytes + io_bytes + tmp_bytes + (4 << 20))))

        return pl.pallas_call(
            kernel,
            out_shape=jax.ShapeDtypeStruct((B_pad, out_pad), jnp.float32),
            grid_spec=pltpu.PrefetchScalarGridSpec(
                num_scalar_prefetch=0,
                grid=(n_tiles,),
                in_specs=in_specs,
                out_specs=out_specs,
            ),
            compiler_params=pltpu.CompilerParams(
                # Batch tiles are independent; this shards them across v7x's
                # two TensorCores only when n_tiles >= 2 (each TC then holds
                # its own copy of the bf16 resident weights).
                dimension_semantics=("parallel",),
                vmem_limit_bytes=vmem_limit),
        )

    args = (x_pad, noise_pad, *w_mats, bias_slab)
    try:
        out = build_call(True)(*args)
    except Exception:
        # Fallback if this jax build rejects pipeline_mode=pl.Buffered(1) on a
        # top-level pallas_call input; only costs 2x resident-weight VMEM.
        out = build_call(False)(*args)
    return out[:B, :seq_length]


# ---------------------------------------------------------------------------
# Pure-JAX reference (lax.conv), used only to verify the kernel's semantics.
# ---------------------------------------------------------------------------
def _leaky(x):
    return jnp.where(x > 0, x, LEAKY_SLOPE * x)


def _conv1d_ref(x, W, b):  # x:(B,Cin,L) W:(Cout,Cin,K)
    y = lax.conv_general_dilated(x, W, (1,), "VALID",
                                 dimension_numbers=("NCH", "OIH", "NCH"))
    return y + b[None, :, None]


def _convtr1d_ref(x, W, b):  # W:(Cin,Cout,K), stride 1, no padding
    K = W.shape[2]
    Wf = jnp.flip(W, axis=2).transpose(1, 0, 2)  # (Cout, Cin, K)
    y = lax.conv_general_dilated(x, Wf, (1,), [(K - 1, K - 1)],
                                 dimension_numbers=("NCH", "OIH", "NCH"))
    return y + b[None, :, None]


def reference_forward(x, noise, enc_convs, final_conv, dec_convs, latent_dim):
    h = x[:, None, :]
    for W, b in enc_convs:
        h = _leaky(_conv1d_ref(h, W, b))
    Wf, bf = final_conv
    h = _conv1d_ref(h, Wf, bf)[:, :, 0]       # (B, 2*latent)  (== .squeeze())
    log_var = h[:, :latent_dim]
    mu = h[:, latent_dim:]
    std = jnp.exp(0.5 * log_var)
    z = mu + std * noise
    d = z[:, :, None]
    for i, (W, b) in enumerate(dec_convs):
        d = _convtr1d_ref(d, W, b)
        if i < len(dec_convs) - 1:
            d = _leaky(d)
    return d[:, 0, :]                          # (B, seq_length) (== .squeeze())


def _bf16_round(a):
    """Round to bf16-representable f32 so bf16 weight storage is exact."""
    return jnp.asarray(a, jnp.bfloat16).astype(jnp.float32)


def _init_uniform(key, shape, fan):
    bound = 1.0 / np.sqrt(fan)
    return _bf16_round(jax.random.uniform(key, shape, minval=-bound,
                                          maxval=bound, dtype=jnp.float32))


if __name__ == "__main__":
    # Small shapes consistent with the module.
    latent_dim, seq_length, num_hiddenchannels, num_hiddenlayers = 4, 16, 8, 1
    B = 2
    K = seq_length // (num_hiddenlayers + 2) + 1                 # 6
    final_k = seq_length - (num_hiddenlayers + 1) * (K - 1)      # 6

    keys = jax.random.split(jax.random.PRNGKey(0), 16)
    ki = 0

    # --- deterministic synthetic parameters (torch layouts) ---
    enc_convs = []                       # Conv1d layers followed by LeakyReLU
    enc_io = [(1, num_hiddenchannels)] + \
             [(num_hiddenchannels, num_hiddenchannels)] * num_hiddenlayers
    for cin, cout in enc_io:
        W = _init_uniform(keys[ki], (cout, cin, K), cin * K); ki += 1
        b = _init_uniform(keys[ki], (cout,), cin * K); ki += 1
        enc_convs.append((W, b))
    Wfin = _init_uniform(keys[ki], (2 * latent_dim, num_hiddenchannels, final_k),
                         num_hiddenchannels * final_k); ki += 1
    bfin = _init_uniform(keys[ki], (2 * latent_dim,),
                         num_hiddenchannels * final_k); ki += 1

    dec_convs = []                       # ConvTranspose1d layers
    Wd = _init_uniform(keys[ki], (latent_dim, num_hiddenchannels, final_k),
                       latent_dim * final_k); ki += 1
    bd = _init_uniform(keys[ki], (num_hiddenchannels,), latent_dim * final_k); ki += 1
    dec_convs.append((Wd, bd))
    for _ in range(num_hiddenlayers):
        Wd = _init_uniform(keys[ki], (num_hiddenchannels, num_hiddenchannels, K),
                           num_hiddenchannels * K); ki += 1
        bd = _init_uniform(keys[ki], (num_hiddenchannels,), num_hiddenchannels * K); ki += 1
        dec_convs.append((Wd, bd))
    Wd = _init_uniform(keys[ki], (num_hiddenchannels, 1, K), num_hiddenchannels * K); ki += 1
    bd = _init_uniform(keys[ki], (1,), num_hiddenchannels * K); ki += 1
    dec_convs.append((Wd, bd))

    # --- inputs ---
    x = _bf16_round(jax.random.normal(keys[ki], (B, seq_length), dtype=jnp.float32)); ki += 1
    # torch.randn(mu.shape) inside getLatentEncoding -> precomputed noise input
    noise = _bf16_round(jax.random.normal(keys[ki], (B, latent_dim), dtype=jnp.float32)); ki += 1

    # --- fold convs into lane-padded bf16 dense matmul weights for the kernel ---
    enc_layers, fused_final, dec_layers, lat_pad = build_dense_layers(
        enc_convs, (Wfin, bfin), dec_convs, latent_dim, seq_length)

    # --- run Pallas kernel ---
    out = cnn_vae_forward(x, noise, enc_layers, fused_final, dec_layers,
                          lat_pad, seq_length)
    out = jax.block_until_ready(out)

    # --- verify against plain-JAX conv reference ---
    ref = jax.block_until_ready(
        reference_forward(x, noise, enc_convs, (Wfin, bfin), dec_convs, latent_dim))
    assert out.shape == (B, seq_length)
    # bf16 MXU passes + bf16 inter-layer activations vs f32-activation XLA conv
    # reference: tolerance covers the per-layer bf16 truncation.
    np.testing.assert_allclose(np.asarray(out), np.asarray(ref),
                               rtol=3e-2, atol=3e-2)

    # TODO(synk): self.kl_loss is a side-effect attribute (not returned by
    # forward); omitted from the kernel output.
    print("KERNEL_OK")
</pallas_src>

<mosaic_0001>
module attributes {stable_mosaic.version = 11 : i64} {
  func.func @kernel(%arg0: i32, %arg1: memref<8x128xf32, #tpu.memory_space<vmem>>, %arg2: memref<8x128xf32, #tpu.memory_space<vmem>>, %arg3: memref<128x128xbf16, #tpu.memory_space<vmem>>, %arg4: memref<128x128xbf16, #tpu.memory_space<vmem>>, %arg5: memref<128x256xbf16, #tpu.memory_space<vmem>>, %arg6: memref<128x128xbf16, #tpu.memory_space<vmem>>, %arg7: memref<128x128xbf16, #tpu.memory_space<vmem>>, %arg8: memref<128x128xbf16, #tpu.memory_space<vmem>>, %arg9: memref<1x896xbf16, #tpu.memory_space<vmem>>, %arg10: memref<8x128xf32, #tpu.memory_space<vmem>>) attributes {dimension_semantics = [#tpu.dimension_semantics<parallel>], iteration_bounds = array<i64: 1>, scalar_prefetch = 0 : i64, scratch_operands = 0 : i64, tpu.core_type = #tpu.core_type<tc>, window_params = [{transform_indices = @transform_0, window_bounds = array<i64: 8, 128>}, {transform_indices = @transform_1, window_bounds = array<i64: 8, 128>}, {pipeline_mode = #tpu.pipeline_mode<synchronous>, transform_indices = @transform_2, window_bounds = array<i64: 128, 128>}, {pipeline_mode = #tpu.pipeline_mode<synchronous>, transform_indices = @transform_3, window_bounds = array<i64: 128, 128>}, {pipeline_mode = #tpu.pipeline_mode<synchronous>, transform_indices = @transform_4, window_bounds = array<i64: 128, 256>}, {pipeline_mode = #tpu.pipeline_mode<synchronous>, transform_indices = @transform_5, window_bounds = array<i64: 128, 128>}, {pipeline_mode = #tpu.pipeline_mode<synchronous>, transform_indices = @transform_6, window_bounds = array<i64: 128, 128>}, {pipeline_mode = #tpu.pipeline_mode<synchronous>, transform_indices = @transform_7, window_bounds = array<i64: 128, 128>}, {pipeline_mode = #tpu.pipeline_mode<synchronous>, transform_indices = @transform_8, window_bounds = array<i64: 1, 896>}, {transform_indices = @transform_9, window_bounds = array<i64: 8, 128>}]} {
    %c0 = arith.constant 0 : index
    %c0_0 = arith.constant 0 : index
    %0 = vector.load %arg9[%c0, %c0_0] : memref<1x896xbf16, #tpu.memory_space<vmem>>, vector<1x896xbf16>
    %c0_1 = arith.constant 0 : index
    %c0_2 = arith.constant 0 : index
    %1 = vector.load %arg1[%c0_1, %c0_2] : memref<8x128xf32, #tpu.memory_space<vmem>>, vector<8x128xf32>
    %2 = arith.truncf %1 : vector<8x128xf32> to vector<8x128xbf16>
    %c0_3 = arith.constant 0 : index
    %c0_4 = arith.constant 0 : index
    %3 = vector.load %arg3[%c0_3, %c0_4] : memref<128x128xbf16, #tpu.memory_space<vmem>>, vector<128x128xbf16>
    %cst = arith.constant dense<0.000000e+00> : vector<8x128xf32>
    %4 = tpu.matmul %2, %3, %cst {dimension_numbers = #tpu.dot_dimension_numbers<[1], [0], [0], [1], [0, 0, 1, 1], [], []>} : vector<8x128xbf16>, vector<128x128xbf16>, vector<8x128xf32> -> vector<8x128xf32>
    %5 = vector.extract_strided_slice %0 {offsets = [0, 0], sizes = [1, 128], strides = [1, 1]} : vector<1x896xbf16> to vector<1x128xbf16>
    %6 = arith.extf %5 : vector<1x128xbf16> to vector<1x128xf32>
    %7 = vector.broadcast %6 : vector<1x128xf32> to vector<8x128xf32>
    %8 = arith.addf %4, %7 : vector<8x128xf32>
    %cst_5 = arith.constant 0.000000e+00 : f32
    %9 = vector.broadcast %cst_5 : f32 to vector<8x128xf32>
    %10 = arith.cmpf ogt, %8, %9 : vector<8x128xf32>
    %cst_6 = arith.constant 0.00999999977 : f32
    %11 = vector.broadcast %cst_6 : f32 to vector<8x128xf32>
    %12 = arith.mulf %11, %8 : vector<8x128xf32>
    %13 = arith.select %10, %8, %12 : vector<8x128xi1>, vector<8x128xf32>
    %14 = arith.truncf %13 : vector<8x128xf32> to vector<8x128xbf16>
    %c0_7 = arith.constant 0 : index
    %c0_8 = arith.constant 0 : index
    %15 = vector.load %arg4[%c0_7, %c0_8] : memref<128x128xbf16, #tpu.memory_space<vmem>>, vector<128x128xbf16>
    %cst_9 = arith.constant dense<0.000000e+00> : vector<8x128xf32>
    %16 = tpu.matmul %14, %15, %cst_9 {dimension_numbers = #tpu.dot_dimension_numbers<[1], [0], [0], [1], [0, 0, 1, 1], [], []>} : vector<8x128xbf16>, vector<128x128xbf16>, vector<8x128xf32> -> vector<8x128xf32>
    %17 = vector.extract_strided_slice %0 {offsets = [0, 128], sizes = [1, 128], strides = [1, 1]} : vector<1x896xbf16> to vector<1x128xbf16>
    %18 = arith.extf %17 : vector<1x128xbf16> to vector<1x128xf32>
    %19 = vector.broadcast %18 : vector<1x128xf32> to vector<8x128xf32>
    %20 = arith.addf %16, %19 : vector<8x128xf32>
    %cst_10 = arith.constant 0.000000e+00 : f32
    %21 = vector.broadcast %cst_10 : f32 to vector<8x128xf32>
    %22 = arith.cmpf ogt, %20, %21 : vector<8x128xf32>
    %cst_11 = arith.constant 0.00999999977 : f32
    %23 = vector.broadcast %cst_11 : f32 to vector<8x128xf32>
    %24 = arith.mulf %23, %20 : vector<8x128xf32>
    %25 = arith.select %22, %20, %24 : vector<8x128xi1>, vector<8x128xf32>
    %26 = arith.truncf %25 : vector<8x128xf32> to vector<8x128xbf16>
    %c0_12 = arith.constant 0 : index
    %c0_13 = arith.constant 0 : index
    %27 = vector.load %arg5[%c0_12, %c0_13] : memref<128x256xbf16, #tpu.memory_space<vmem>>, vector<128x256xbf16>
    %cst_14 = arith.constant dense<0.000000e+00> : vector<8x256xf32>
    %28 = tpu.matmul %26, %27, %cst_14 {dimension_numbers = #tpu.dot_dimension_numbers<[1], [0], [0], [1], [0, 0, 1, 1], [], []>} : vector<8x128xbf16>, vector<128x256xbf16>, vector<8x256xf32> -> vector<8x256xf32>
    %29 = vector.extract_strided_slice %0 {offsets = [0, 256], sizes = [1, 256], strides = [1, 1]} : vector<1x896xbf16> to vector<1x256xbf16>
    %30 = arith.extf %29 : vector<1x256xbf16> to vector<1x256xf32>
    %31 = vector.broadcast %30 : vector<1x256xf32> to vector<8x256xf32>
    %32 = arith.addf %28, %31 : vector<8x256xf32>
    %33 = vector.extract_strided_slice %32 {offsets = [0, 0], sizes = [8, 128], strides = [1, 1]} : vector<8x256xf32> to vector<8x128xf32>
    %34 = vector.extract_strided_slice %32 {offsets = [0, 128], sizes = [8, 128], strides = [1, 1]} : vector<8x256xf32> to vector<8x128xf32>
    %35 = math.exp %33 : vector<8x128xf32>
    %c0_15 = arith.constant 0 : index
    %c0_16 = arith.constant 0 : index
    %36 = vector.load %arg2[%c0_15, %c0_16] : memref<8x128xf32, #tpu.memory_space<vmem>>, vector<8x128xf32>
    %37 = arith.mulf %35, %36 : vector<8x128xf32>
    %38 = arith.addf %34, %37 : vector<8x128xf32>
    %39 = arith.truncf %38 : vector<8x128xf32> to vector<8x128xbf16>
    %c0_17 = arith.constant 0 : index
    %c0_18 = arith.constant 0 : index
    %40 = vector.load %arg6[%c0_17, %c0_18] : memref<128x128xbf16, #tpu.memory_space<vmem>>, vector<128x128xbf16>
    %cst_19 = arith.constant dense<0.000000e+00> : vector<8x128xf32>
    %41 = tpu.matmul %39, %40, %cst_19 {dimension_numbers = #tpu.dot_dimension_numbers<[1], [0], [0], [1], [0, 0, 1, 1], [], []>} : vector<8x128xbf16>, vector<128x128xbf16>, vector<8x128xf32> -> vector<8x128xf32>
    %42 = vector.extract_strided_slice %0 {offsets = [0, 512], sizes = [1, 128], strides = [1, 1]} : vector<1x896xbf16> to vector<1x128xbf16>
    %43 = arith.extf %42 : vector<1x128xbf16> to vector<1x128xf32>
    %44 = vector.broadcast %43 : vector<1x128xf32> to vector<8x128xf32>
    %45 = arith.addf %41, %44 : vector<8x128xf32>
    %cst_20 = arith.constant 0.000000e+00 : f32
    %46 = vector.broadcast %cst_20 : f32 to vector<8x128xf32>
    %47 = arith.cmpf ogt, %45, %46 : vector<8x128xf32>
    %cst_21 = arith.constant 0.00999999977 : f32
    %48 = vector.broadcast %cst_21 : f32 to vector<8x128xf32>
    %49 = arith.mulf %48, %45 : vector<8x128xf32>
    %50 = arith.select %47, %45, %49 : vector<8x128xi1>, vector<8x128xf32>
    %51 = arith.truncf %50 : vector<8x128xf32> to vector<8x128xbf16>
    %c0_22 = arith.constant 0 : index
    %c0_23 = arith.constant 0 : index
    %52 = vector.load %arg7[%c0_22, %c0_23] : memref<128x128xbf16, #tpu.memory_space<vmem>>, vector<128x128xbf16>
    %cst_24 = arith.constant dense<0.000000e+00> : vector<8x128xf32>
    %53 = tpu.matmul %51, %52, %cst_24 {dimension_numbers = #tpu.dot_dimension_numbers<[1], [0], [0], [1], [0, 0, 1, 1], [], []>} : vector<8x128xbf16>, vector<128x128xbf16>, vector<8x128xf32> -> vector<8x128xf32>
    %54 = vector.extract_strided_slice %0 {offsets = [0, 640], sizes = [1, 128], strides = [1, 1]} : vector<1x896xbf16> to vector<1x128xbf16>
    %55 = arith.extf %54 : vector<1x128xbf16> to vector<1x128xf32>
    %56 = vector.broadcast %55 : vector<1x128xf32> to vector<8x128xf32>
    %57 = arith.addf %53, %56 : vector<8x128xf32>
    %cst_25 = arith.constant 0.000000e+00 : f32
    %58 = vector.broadcast %cst_25 : f32 to vector<8x128xf32>
    %59 = arith.cmpf ogt, %57, %58 : vector<8x128xf32>
    %cst_26 = arith.constant 0.00999999977 : f32
    %60 = vector.broadcast %cst_26 : f32 to vector<8x128xf32>
    %61 = arith.mulf %60, %57 : vector<8x128xf32>
    %62 = arith.select %59, %57, %61 : vector<8x128xi1>, vector<8x128xf32>
    %63 = arith.truncf %62 : vector<8x128xf32> to vector<8x128xbf16>
    %c0_27 = arith.constant 0 : index
    %c0_28 = arith.constant 0 : index
    %64 = vector.load %arg8[%c0_27, %c0_28] : memref<128x128xbf16, #tpu.memory_space<vmem>>, vector<128x128xbf16>
    %cst_29 = arith.constant dense<0.000000e+00> : vector<8x128xf32>
    %65 = tpu.matmul %63, %64, %cst_29 {dimension_numbers = #tpu.dot_dimension_numbers<[1], [0], [0], [1], [0, 0, 1, 1], [], []>} : vector<8x128xbf16>, vector<128x128xbf16>, vector<8x128xf32> -> vector<8x128xf32>
    %66 = vector.extract_strided_slice %0 {offsets = [0, 768], sizes = [1, 128], strides = [1, 1]} : vector<1x896xbf16> to vector<1x128xbf16>
    %67 = arith.extf %66 : vector<1x128xbf16> to vector<1x128xf32>
    %68 = vector.broadcast %67 : vector<1x128xf32> to vector<8x128xf32>
    %69 = arith.addf %65, %68 : vector<8x128xf32>
    %c0_30 = arith.constant 0 : index
    %c0_31 = arith.constant 0 : index
    %70 = vector.load %arg10[%c0_30, %c0_31] : memref<8x128xf32, #tpu.memory_space<vmem>>, vector<8x128xf32>
    tpu.vector_store %arg10[%c0_30, %c0_31], %69 {strides = array<i32>} : memref<8x128xf32, #tpu.memory_space<vmem>>, vector<8x128xf32>,
    return
  }
  func.func @transform_0(%arg0: i32) -> (i32, i32) {
    %c0_i32 = arith.constant 0 : i32
    %c0_i32_0 = arith.constant 0 : i32
    return %arg0, %c0_i32 : i32, i32
  }
  func.func @transform_1(%arg0: i32) -> (i32, i32) {
    %c0_i32 = arith.constant 0 : i32
    %c0_i32_0 = arith.constant 0 : i32
    return %arg0, %c0_i32 : i32, i32
  }
  func.func @transform_2(%arg0: i32) -> (i32, i32) {
    %c0_i32 = arith.constant 0 : i32
    %c0_i32_0 = arith.constant 0 : i32
    %c0_i32_1 = arith.constant 0 : i32
    return %c0_i32, %c0_i32_0 : i32, i32
  }
  func.func @transform_3(%arg0: i32) -> (i32, i32) {
    %c0_i32 = arith.constant 0 : i32
    %c0_i32_0 = arith.constant 0 : i32
    %c0_i32_1 = arith.constant 0 : i32
    return %c0_i32, %c0_i32_0 : i32, i32
  }
  func.func @transform_4(%arg0: i32) -> (i32, i32) {
    %c0_i32 = arith.constant 0 : i32
    %c0_i32_0 = arith.constant 0 : i32
    %c0_i32_1 = arith.constant 0 : i32
    return %c0_i32, %c0_i32_0 : i32, i32
  }
  func.func @transform_5(%arg0: i32) -> (i32, i32) {
    %c0_i32 = arith.constant 0 : i32
    %c0_i32_0 = arith.constant 0 : i32
    %c0_i32_1 = arith.constant 0 : i32
    return %c0_i32, %c0_i32_0 : i32, i32
  }
  func.func @transform_6(%arg0: i32) -> (i32, i32) {
    %c0_i32 = arith.constant 0 : i32
    %c0_i32_0 = arith.constant 0 : i32
    %c0_i32_1 = arith.constant 0 : i32
    return %c0_i32, %c0_i32_0 : i32, i32
  }
  func.func @transform_7(%arg0: i32) -> (i32, i32) {
    %c0_i32 = arith.constant 0 : i32
    %c0_i32_0 = arith.constant 0 : i32
    %c0_i32_1 = arith.constant 0 : i32
    return %c0_i32, %c0_i32_0 : i32, i32
  }
  func.func @transform_8(%arg0: i32) -> (i32, i32) {
    %c0_i32 = arith.constant 0 : i32
    %c0_i32_0 = arith.constant 0 : i32
    %c0_i32_1 = arith.constant 0 : i32
    return %c0_i32, %c0_i32_0 : i32, i32
  }
  func.func @transform_9(%arg0: i32) -> (i32, i32) {
    %c0_i32 = arith.constant 0 : i32
    %c0_i32_0 = arith.constant 0 : i32
    return %arg0, %c0_i32 : i32, i32
  }
}

module attributes {stable_mosaic.version = 11 : i64} {
  func.func @kernel(%arg0: i32, %arg1: memref<8x128xf32, #tpu.memory_space<vmem>>, %arg2: memref<8x128xf32, #tpu.memory_space<vmem>>, %arg3: memref<128x128xbf16, #tpu.memory_space<vmem>>, %arg4: memref<128x128xbf16, #tpu.memory_space<vmem>>, %arg5: memref<128x256xbf16, #tpu.memory_space<vmem>>, %arg6: memref<128x128xbf16, #tpu.memory_space<vmem>>, %arg7: memref<128x128xbf16, #tpu.memory_space<vmem>>, %arg8: memref<128x128xbf16, #tpu.memory_space<vmem>>, %arg9: memref<1x896xbf16, #tpu.memory_space<vmem>>, %arg10: memref<8x128xf32, #tpu.memory_space<vmem>>) attributes {dimension_semantics = [#tpu.dimension_semantics<parallel>], iteration_bounds = array<i64: 1>, scalar_prefetch = 0 : i64, scratch_operands = 0 : i64, tpu.core_type = #tpu.core_type<tc>, window_params = [{transform_indices = @transform_0, window_bounds = array<i64: 8, 128>}, {transform_indices = @transform_1, window_bounds = array<i64: 8, 128>}, {pipeline_mode = #tpu.pipeline_mode<synchronous>, transform_indices = @transform_2, window_bounds = array<i64: 128, 128>}, {pipeline_mode = #tpu.pipeline_mode<synchronous>, transform_indices = @transform_3, window_bounds = array<i64: 128, 128>}, {pipeline_mode = #tpu.pipeline_mode<synchronous>, transform_indices = @transform_4, window_bounds = array<i64: 128, 256>}, {pipeline_mode = #tpu.pipeline_mode<synchronous>, transform_indices = @transform_5, window_bounds = array<i64: 128, 128>}, {pipeline_mode = #tpu.pipeline_mode<synchronous>, transform_indices = @transform_6, window_bounds = array<i64: 128, 128>}, {pipeline_mode = #tpu.pipeline_mode<synchronous>, transform_indices = @transform_7, window_bounds = array<i64: 128, 128>}, {pipeline_mode = #tpu.pipeline_mode<synchronous>, transform_indices = @transform_8, window_bounds = array<i64: 1, 896>}, {transform_indices = @transform_9, window_bounds = array<i64: 8, 128>}]} {
    %c0 = arith.constant 0 : index
    %c0_0 = arith.constant 0 : index
    %0 = vector.load %arg9[%c0, %c0_0] : memref<1x896xbf16, #tpu.memory_space<vmem>>, vector<1x896xbf16>
    %c0_1 = arith.constant 0 : index
    %c0_2 = arith.constant 0 : index
    %1 = vector.load %arg1[%c0_1, %c0_2] : memref<8x128xf32, #tpu.memory_space<vmem>>, vector<8x128xf32>
    %2 = arith.truncf %1 : vector<8x128xf32> to vector<8x128xbf16>
    %c0_3 = arith.constant 0 : index
    %c0_4 = arith.constant 0 : index
    %3 = vector.load %arg3[%c0_3, %c0_4] : memref<128x128xbf16, #tpu.memory_space<vmem>>, vector<128x128xbf16>
    %cst = arith.constant dense<0.000000e+00> : vector<8x128xf32>
    %4 = tpu.matmul %2, %3, %cst {dimension_numbers = #tpu.dot_dimension_numbers<[1], [0], [0], [1], [0, 0, 1, 1], [], []>} : vector<8x128xbf16>, vector<128x128xbf16>, vector<8x128xf32> -> vector<8x128xf32>
    %5 = vector.extract_strided_slice %0 {offsets = [0, 0], sizes = [1, 128], strides = [1, 1]} : vector<1x896xbf16> to vector<1x128xbf16>
    %6 = arith.extf %5 : vector<1x128xbf16> to vector<1x128xf32>
    %7 = vector.broadcast %6 : vector<1x128xf32> to vector<8x128xf32>
    %8 = arith.addf %4, %7 : vector<8x128xf32>
    %cst_5 = arith.constant 0.000000e+00 : f32
    %9 = vector.broadcast %cst_5 : f32 to vector<8x128xf32>
    %10 = arith.cmpf ogt, %8, %9 : vector<8x128xf32>
    %cst_6 = arith.constant 0.00999999977 : f32
    %11 = vector.broadcast %cst_6 : f32 to vector<8x128xf32>
    %12 = arith.mulf %11, %8 : vector<8x128xf32>
    %13 = arith.select %10, %8, %12 : vector<8x128xi1>, vector<8x128xf32>
    %14 = arith.truncf %13 : vector<8x128xf32> to vector<8x128xbf16>
    %c0_7 = arith.constant 0 : index
    %c0_8 = arith.constant 0 : index
    %15 = vector.load %arg4[%c0_7, %c0_8] : memref<128x128xbf16, #tpu.memory_space<vmem>>, vector<128x128xbf16>
    %cst_9 = arith.constant dense<0.000000e+00> : vector<8x128xf32>
    %16 = tpu.matmul %14, %15, %cst_9 {dimension_numbers = #tpu.dot_dimension_numbers<[1], [0], [0], [1], [0, 0, 1, 1], [], []>} : vector<8x128xbf16>, vector<128x128xbf16>, vector<8x128xf32> -> vector<8x128xf32>
    %17 = vector.extract_strided_slice %0 {offsets = [0, 128], sizes = [1, 128], strides = [1, 1]} : vector<1x896xbf16> to vector<1x128xbf16>
    %18 = arith.extf %17 : vector<1x128xbf16> to vector<1x128xf32>
    %19 = vector.broadcast %18 : vector<1x128xf32> to vector<8x128xf32>
    %20 = arith.addf %16, %19 : vector<8x128xf32>
    %cst_10 = arith.constant 0.000000e+00 : f32
    %21 = vector.broadcast %cst_10 : f32 to vector<8x128xf32>
    %22 = arith.cmpf ogt, %20, %21 : vector<8x128xf32>
    %cst_11 = arith.constant 0.00999999977 : f32
    %23 = vector.broadcast %cst_11 : f32 to vector<8x128xf32>
    %24 = arith.mulf %23, %20 : vector<8x128xf32>
    %25 = arith.select %22, %20, %24 : vector<8x128xi1>, vector<8x128xf32>
    %26 = arith.truncf %25 : vector<8x128xf32> to vector<8x128xbf16>
    %c0_12 = arith.constant 0 : index
    %c0_13 = arith.constant 0 : index
    %27 = vector.load %arg5[%c0_12, %c0_13] : memref<128x256xbf16, #tpu.memory_space<vmem>>, vector<128x256xbf16>
    %cst_14 = arith.constant dense<0.000000e+00> : vector<8x256xf32>
    %28 = tpu.matmul %26, %27, %cst_14 {dimension_numbers = #tpu.dot_dimension_numbers<[1], [0], [0], [1], [0, 0, 1, 1], [], []>} : vector<8x128xbf16>, vector<128x256xbf16>, vector<8x256xf32> -> vector<8x256xf32>
    %29 = vector.extract_strided_slice %0 {offsets = [0, 256], sizes = [1, 256], strides = [1, 1]} : vector<1x896xbf16> to vector<1x256xbf16>
    %30 = arith.extf %29 : vector<1x256xbf16> to vector<1x256xf32>
    %31 = vector.broadcast %30 : vector<1x256xf32> to vector<8x256xf32>
    %32 = arith.addf %28, %31 : vector<8x256xf32>
    %33 = vector.extract_strided_slice %32 {offsets = [0, 0], sizes = [8, 128], strides = [1, 1]} : vector<8x256xf32> to vector<8x128xf32>
    %34 = vector.extract_strided_slice %32 {offsets = [0, 128], sizes = [8, 128], strides = [1, 1]} : vector<8x256xf32> to vector<8x128xf32>
    %35 = math.exp %33 : vector<8x128xf32>
    %c0_15 = arith.constant 0 : index
    %c0_16 = arith.constant 0 : index
    %36 = vector.load %arg2[%c0_15, %c0_16] : memref<8x128xf32, #tpu.memory_space<vmem>>, vector<8x128xf32>
    %37 = arith.mulf %35, %36 : vector<8x128xf32>
    %38 = arith.addf %34, %37 : vector<8x128xf32>
    %39 = arith.truncf %38 : vector<8x128xf32> to vector<8x128xbf16>
    %c0_17 = arith.constant 0 : index
    %c0_18 = arith.constant 0 : index
    %40 = vector.load %arg6[%c0_17, %c0_18] : memref<128x128xbf16, #tpu.memory_space<vmem>>, vector<128x128xbf16>
    %cst_19 = arith.constant dense<0.000000e+00> : vector<8x128xf32>
    %41 = tpu.matmul %39, %40, %cst_19 {dimension_numbers = #tpu.dot_dimension_numbers<[1], [0], [0], [1], [0, 0, 1, 1], [], []>} : vector<8x128xbf16>, vector<128x128xbf16>, vector<8x128xf32> -> vector<8x128xf32>
    %42 = vector.extract_strided_slice %0 {offsets = [0, 512], sizes = [1, 128], strides = [1, 1]} : vector<1x896xbf16> to vector<1x128xbf16>
    %43 = arith.extf %42 : vector<1x128xbf16> to vector<1x128xf32>
    %44 = vector.broadcast %43 : vector<1x128xf32> to vector<8x128xf32>
    %45 = arith.addf %41, %44 : vector<8x128xf32>
    %cst_20 = arith.constant 0.000000e+00 : f32
    %46 = vector.broadcast %cst_20 : f32 to vector<8x128xf32>
    %47 = arith.cmpf ogt, %45, %46 : vector<8x128xf32>
    %cst_21 = arith.constant 0.00999999977 : f32
    %48 = vector.broadcast %cst_21 : f32 to vector<8x128xf32>
    %49 = arith.mulf %48, %45 : vector<8x128xf32>
    %50 = arith.select %47, %45, %49 : vector<8x128xi1>, vector<8x128xf32>
    %51 = arith.truncf %50 : vector<8x128xf32> to vector<8x128xbf16>
    %c0_22 = arith.constant 0 : index
    %c0_23 = arith.constant 0 : index
    %52 = vector.load %arg7[%c0_22, %c0_23] : memref<128x128xbf16, #tpu.memory_space<vmem>>, vector<128x128xbf16>
    %cst_24 = arith.constant dense<0.000000e+00> : vector<8x128xf32>
    %53 = tpu.matmul %51, %52, %cst_24 {dimension_numbers = #tpu.dot_dimension_numbers<[1], [0], [0], [1], [0, 0, 1, 1], [], []>} : vector<8x128xbf16>, vector<128x128xbf16>, vector<8x128xf32> -> vector<8x128xf32>
    %54 = vector.extract_strided_slice %0 {offsets = [0, 640], sizes = [1, 128], strides = [1, 1]} : vector<1x896xbf16> to vector<1x128xbf16>
    %55 = arith.extf %54 : vector<1x128xbf16> to vector<1x128xf32>
    %56 = vector.broadcast %55 : vector<1x128xf32> to vector<8x128xf32>
    %57 = arith.addf %53, %56 : vector<8x128xf32>
    %cst_25 = arith.constant 0.000000e+00 : f32
    %58 = vector.broadcast %cst_25 : f32 to vector<8x128xf32>
    %59 = arith.cmpf ogt, %57, %58 : vector<8x128xf32>
    %cst_26 = arith.constant 0.00999999977 : f32
    %60 = vector.broadcast %cst_26 : f32 to vector<8x128xf32>
    %61 = arith.mulf %60, %57 : vector<8x128xf32>
    %62 = arith.select %59, %57, %61 : vector<8x128xi1>, vector<8x128xf32>
    %63 = arith.truncf %62 : vector<8x128xf32> to vector<8x128xbf16>
    %c0_27 = arith.constant 0 : index
    %c0_28 = arith.constant 0 : index
    %64 = vector.load %arg8[%c0_27, %c0_28] : memref<128x128xbf16, #tpu.memory_space<vmem>>, vector<128x128xbf16>
    %cst_29 = arith.constant dense<0.000000e+00> : vector<8x128xf32>
    %65 = tpu.matmul %63, %64, %cst_29 {dimension_numbers = #tpu.dot_dimension_numbers<[1], [0], [0], [1], [0, 0, 1, 1], [], []>} : vector<8x128xbf16>, vector<128x128xbf16>, vector<8x128xf32> -> vector<8x128xf32>
    %66 = vector.extract_strided_slice %0 {offsets = [0, 768], sizes = [1, 128], strides = [1, 1]} : vector<1x896xbf16> to vector<1x128xbf16>
    %67 = arith.extf %66 : vector<1x128xbf16> to vector<1x128xf32>
    %68 = vector.broadcast %67 : vector<1x128xf32> to vector<8x128xf32>
    %69 = arith.addf %65, %68 : vector<8x128xf32>
    %c0_30 = arith.constant 0 : index
    %c0_31 = arith.constant 0 : index
    %70 = vector.load %arg10[%c0_30, %c0_31] : memref<8x128xf32, #tpu.memory_space<vmem>>, vector<8x128xf32>
    tpu.vector_store %arg10[%c0_30, %c0_31], %69 {strides = array<i32>} : memref<8x128xf32, #tpu.memory_space<vmem>>, vector<8x128xf32>,
    return
  }
  func.func @transform_0(%arg0: i32) -> (i32, i32) {
    %c0_i32 = arith.constant 0 : i32
    %c0_i32_0 = arith.constant 0 : i32
    return %arg0, %c0_i32 : i32, i32
  }
  func.func @transform_1(%arg0: i32) -> (i32, i32) {
    %c0_i32 = arith.constant 0 : i32
    %c0_i32_0 = arith.constant 0 : i32
    return %arg0, %c0_i32 : i32, i32
  }
  func.func @transform_2(%arg0: i32) -> (i32, i32) {
    %c0_i32 = arith.constant 0 : i32
    %c0_i32_0 = arith.constant 0 : i32
    %c0_i32_1 = arith.constant 0 : i32
    return %c0_i32, %c0_i32_0 : i32, i32
  }
  func.func @transform_3(%arg0: i32) -> (i32, i32) {
    %c0_i32 = arith.constant 0 : i32
    %c0_i32_0 = arith.constant 0 : i32
    %c0_i32_1 = arith.constant 0 : i32
    return %c0_i32, %c0_i32_0 : i32, i32
  }
  func.func @transform_4(%arg0: i32) -> (i32, i32) {
    %c0_i32 = arith.constant 0 : i32
    %c0_i32_0 = arith.constant 0 : i32
    %c0_i32_1 = arith.constant 0 : i32
    return %c0_i32, %c0_i32_0 : i32, i32
  }
  func.func @transform_5(%arg0: i32) -> (i32, i32) {
    %c0_i32 = arith.constant 0 : i32
    %c0_i32_0 = arith.constant 0 : i32
    %c0_i32_1 = arith.constant 0 : i32
    return %c0_i32, %c0_i32_0 : i32, i32
  }
  func.func @transform_6(%arg0: i32) -> (i32, i32) {
    %c0_i32 = arith.constant 0 : i32
    %c0_i32_0 = arith.constant 0 : i32
    %c0_i32_1 = arith.constant 0 : i32
    return %c0_i32, %c0_i32_0 : i32, i32
  }
  func.func @transform_7(%arg0: i32) -> (i32, i32) {
    %c0_i32 = arith.constant 0 : i32
    %c0_i32_0 = arith.constant 0 : i32
    %c0_i32_1 = arith.constant 0 : i32
    return %c0_i32, %c0_i32_0 : i32, i32
  }
  func.func @transform_8(%arg0: i32) -> (i32, i32) {
    %c0_i32 = arith.constant 0 : i32
    %c0_i32_0 = arith.constant 0 : i32
    %c0_i32_1 = arith.constant 0 : i32
    return %c0_i32, %c0_i32_0 : i32, i32
  }
  func.func @transform_9(%arg0: i32) -> (i32, i32) {
    %c0_i32 = arith.constant 0 : i32
    %c0_i32_0 = arith.constant 0 : i32
    return %arg0, %c0_i32 : i32, i32
  }
}

</mosaic_0001>

<bundles_post_ra>
// kernel: tpu_custom_call.1
= control target key start
LH: loop header
LB: loop body
LE: loop exit
PB: predicated region body
PF: predicated region fallthrough
CT: control target
= control target key end

     0   :  { %14 = vsyncpa [#allocation3], 0  ;;  %s1555_s0 = inlined_call_operand.hbm [shape: f32[8,128], index: 0, kind: input, shape index: {}]   ;;  %s1556_s1 = inlined_call_operand.hbm [shape: f32[8,128], index: 1, kind: input, shape index: {}]   ;;  %s1557_s2 = inlined_call_operand.hbm [shape: bf16[128,128], index: 2, kind: input, shape index: {}]   ;;  %s1558_s3 = inlined_call_operand.hbm [shape: bf16[128,128], index: 3, kind: input, shape index: {}]   ;;  %s1559_s4 = inlined_call_operand.hbm [shape: bf16[128,256], index: 4, kind: input, shape index: {}]   ;;  %s1560_s5 = inlined_call_operand.hbm [shape: bf16[128,128], index: 5, kind: input, shape index: {}]   ;;  %s1561_s6 = inlined_call_operand.hbm [shape: bf16[128,128], index: 6, kind: input, shape index: {}]   ;;  %s1562_s7 = inlined_call_operand.hbm [shape: bf16[128,128], index: 7, kind: input, shape index: {}]   ;;  %s1563_s8 = inlined_call_operand.vmem [shape: bf16[1,896], index: 8, kind: input, shape index: {}]   ;;  %s1564_s9 = inlined_call_operand.hbm [shape: f32[8,128], index: 9, kind: output, shape index: {}]  }
   0x1   :  { %15 = vsyncpa [#allocation6], 0 }
   0x2   :  { %16 = vsyncpa [#allocation9], 0 }
   0x3   :  { %17 = vsyncpa [#allocation12], 0 }
   0x4   :  { %18 = vsyncpa [#allocation15], 0 }
   0x5   :  { %19 = vsyncpa [#allocation4], 0  ;;  %s1372_s30 = smov [#allocation5]  }
   0x6   :  { %s36_s10 = sshll.u32 %s1372_s30, 4  ;;  %s37_s10 = int_to_ptr.vmem [resolvable:$true] %s36_s10 }
   0x7   :  { %s1188_s11 = scalar_lea.vmem %s37_s10, 128  ;;  %p1193_p1 = scmp.lt.s32.totalorder %s37_s10, %s37_s10 }
   0x8   :  { %p1189_p0 = scmp.ne.s32.totalorder %s37_s10, %s1188_s11  ;;  %p1194_p2 = scmp.lt.s32.totalorder %s1188_s11, %s1188_s11 }
   0xa   :  { %p1195_p3 = por %p1194_p2, %p1193_p1 }
   0xc   :  { %p1196_p4 = pnand %p1195_p3, %p1189_p0 }
   0xe   :  { %1199 = shalt.err (!%p1196_p4)
}
   0xf   :  { %39 = dma.hbm_to_vmem [thread:$0]  %s1556_s1, 128, %s37_s10, [#allocation6]  }
  0x10   :  { %s1373_s14 = smov [#allocation8]   ;;  %s1374_s16 = smov [#allocation11]  }
  0x11   :  { %s57_s15 = sshll.u32 %s1373_s14, 4  ;;  %s81_s17 = sshll.u32 %s1374_s16, 4  ;;  %s58_s15 = int_to_ptr.vmem [resolvable:$true] %s57_s15  ;;  %s82_s17 = int_to_ptr.vmem [resolvable:$true] %s81_s17 }
  0x12   :  { %s1208_s18 = scalar_lea.vmem %s58_s15, 1024  ;;  %p1213_p6 = scmp.lt.s32.totalorder %s58_s15, %s58_s15 }
  0x13   :  { %p1209_p5 = scmp.ne.s32.totalorder %s58_s15, %s1208_s18  ;;  %p1214_p7 = scmp.lt.s32.totalorder %s1208_s18, %s1208_s18 }
  0x15   :  { %p1215_p8 = por %p1214_p7, %p1213_p6 }
  0x17   :  { %p1216_p9 = pnand %p1215_p8, %p1209_p5 }
  0x19   :  { %1219 = shalt.err (!%p1216_p9)
}
  0x1a   :  { %s1375_s19 = smov 64   ;;  %s1376_s20 = smov 4  }
  0x1b   :  { %63 = dma.hbm_to_vmem [thread:$0]  %s1558_s3, 1024, %s58_s15, [#allocation9], %s1375_s19, %s1375_s19, %s1376_s20  }
  0x1c   :  { %s1228_s1 = scalar_lea.vmem %s82_s17, 1024  ;;  %p1233_p11 = scmp.lt.s32.totalorder %s82_s17, %s82_s17 }
  0x1d   :  { %p1229_p10 = scmp.ne.s32.totalorder %s82_s17, %s1228_s1  ;;  %p1234_p12 = scmp.lt.s32.totalorder %s1228_s1, %s1228_s1 }
  0x1f   :  { %p1235_p13 = por %p1234_p12, %p1233_p11 }
  0x21   :  { %p1236_p0 = pnand %p1235_p13, %p1229_p10 }
  0x23   :  { %1239 = shalt.err (!%p1236_p0)
}
  0x24   :  { %87 = dma.hbm_to_vmem [thread:$0]  %s1560_s5, 1024, %s82_s17, [#allocation12], %s1375_s19, %s1375_s19, %s1376_s20  }
  0x25   :  { %s1377_s25 = smov [#allocation2]   ;;  %s1378_s27 = smov [#allocation7]  }
  0x26   :  { %s26_s26 = sshll.u32 %s1377_s25, 4  ;;  %s45_s3 = sshll.u32 %s1378_s27, 4  ;;  %s27_s26 = int_to_ptr.vmem [resolvable:$true] %s26_s26  ;;  %s46_s3 = int_to_ptr.vmem [resolvable:$true] %s45_s3 }
  0x27   :  { %s1248_s28 = scalar_lea.vmem %s27_s26, 128  ;;  %p1253_p2 = scmp.lt.s32.totalorder %s27_s26, %s27_s26 }
  0x28   :  { %p1249_p1 = scmp.ne.s32.totalorder %s27_s26, %s1248_s28  ;;  %p1254_p3 = scmp.lt.s32.totalorder %s1248_s28, %s1248_s28 }
  0x2a   :  { %p1255_p4 = por %p1254_p3, %p1253_p2 }
  0x2c   :  { %p1256_p5 = pnand %p1255_p4, %p1249_p1 }
  0x2e   :  { %1259 = shalt.err (!%p1256_p5)
}
  0x2f   :  { %29 = dma.hbm_to_vmem [thread:$0]  %s1555_s0, 128, %s27_s26, [#allocation3]  }
  0x30   :  { %s1268_s10 = scalar_lea.vmem %s46_s3, 1024  ;;  %p1273_p7 = scmp.lt.s32.totalorder %s46_s3, %s46_s3 }
  0x31   :  { %p1269_p6 = scmp.ne.s32.totalorder %s46_s3, %s1268_s10  ;;  %p1274_p8 = scmp.lt.s32.totalorder %s1268_s10, %s1268_s10 }
  0x33   :  { %p1275_p9 = por %p1274_p8, %p1273_p7 }
  0x35   :  { %p1276_p10 = pnand %p1275_p9, %p1269_p6 }
  0x37   :  { %1279 = shalt.err (!%p1276_p10)
}
  0x38   :  { %51 = dma.hbm_to_vmem [thread:$0]  %s1557_s2, 1024, %s46_s3, [#allocation6], %s1375_s19, %s1375_s19, %s1376_s20  }
  0x39   :  { %s1379_s12 = smov [#allocation10]  }
  0x3a   :  { %s69_s13 = sshll.u32 %s1379_s12, 4  ;;  %s70_s13 = int_to_ptr.vmem [resolvable:$true] %s69_s13 }
  0x3b   :  { %s1288_s14 = scalar_lea.vmem %s70_s13, 2048  ;;  %p1293_p12 = scmp.lt.s32.totalorder %s70_s13, %s70_s13 }
  0x3c   :  { %p1289_p11 = scmp.ne.s32.totalorder %s70_s13, %s1288_s14  ;;  %p1294_p13 = scmp.lt.s32.totalorder %s1288_s14, %s1288_s14 }
  0x3e   :  { %p1295_p0 = por %p1294_p13, %p1293_p12 }
  0x40   :  { %p1296_p1 = pnand %p1295_p0, %p1289_p11 }
  0x42   :  { %1299 = shalt.err (!%p1296_p1)
}
  0x43   :  { %s1380_s0 = smov 128   ;;  %s1381_s15 = smov 8  }
  0x44   :  { %75 = dma.hbm_to_vmem [thread:$0]  %s1559_s4, 2048, %s70_s13, [#allocation9], %s1380_s0, %s1380_s0, %s1381_s15  }
  0x45   :  { %s1382_s18 = smov [#allocation13]   ;;  %s1383_s22 = smov [#allocation14]  }
  0x46   :  { %s93_s21 = sshll.u32 %s1382_s18, 4  ;;  %s105_s2 = sshll.u32 %s1383_s22, 4  ;;  %s94_s21 = int_to_ptr.vmem [resolvable:$true] %s93_s21  ;;  %s106_s2 = int_to_ptr.vmem [resolvable:$true] %s105_s2 }
  0x47   :  { %s1308_s1 = scalar_lea.vmem %s94_s21, 1024  ;;  %p1313_p3 = scmp.lt.s32.totalorder %s94_s21, %s94_s21 }
  0x48   :  { %p1309_p2 = scmp.ne.s32.totalorder %s94_s21, %s1308_s1  ;;  %p1314_p4 = scmp.lt.s32.totalorder %s1308_s1, %s1308_s1 }
  0x4a   :  { %p1315_p5 = por %p1314_p4, %p1313_p3 }
  0x4c   :  { %p1316_p6 = pnand %p1315_p5, %p1309_p2 }
  0x4e   :  { %1319 = shalt.err (!%p1316_p6)
}
  0x4f   :  { %99 = dma.hbm_to_vmem [thread:$0]  %s1561_s6, 1024, %s94_s21, [#allocation12], %s1375_s19, %s1375_s19, %s1376_s20  }
  0x50   :  { %s1328_s4 = scalar_lea.vmem %s106_s2, 1024  ;;  %p1333_p8 = scmp.lt.s32.totalorder %s106_s2, %s106_s2 }
  0x51   :  { %p1329_p7 = scmp.ne.s32.totalorder %s106_s2, %s1328_s4  ;;  %p1334_p9 = scmp.lt.s32.totalorder %s1328_s4, %s1328_s4 }
  0x53   :  { %p1335_p10 = por %p1334_p9, %p1333_p8 }
  0x55   :  { %p1336_p11 = pnand %p1335_p10, %p1329_p7 }
  0x57   :  { %1339 = shalt.err (!%p1336_p11)
}
  0x58   :  { %111 = dma.hbm_to_vmem [thread:$0]  %s1562_s7, 1024, %s106_s2, [#allocation15], %s1375_s19, %s1375_s19, %s1376_s20  }
  0x59   :  { %1360 = dma.done.wait [#allocation3], 128  }
  0x5a   :  { %1361 = vsyncadd [#allocation3], 4294967168 }
  0x5b   :  { %1362 = dma.done.wait [#allocation6], 1152  }
  0x5c   :  { %1363 = vsyncadd [#allocation6], 4294966144 }
  0x5d   :  { %1364 = dma.done.wait [#allocation9], 3072  }
  0x5e   :  { %1365 = vsyncadd [#allocation9], 4294964224 }
  0x5f   :  { %1366 = dma.done.wait [#allocation12], 2048  }
  0x60   :  { %1367 = vsyncadd [#allocation12], 4294965248 }
  0x61   :  { %1368 = dma.done.wait [#allocation15], 1024  }
  0x62   :  { %1369 = vsyncadd [#allocation15], 4294966272  ;;  %v1384_v0 = vmov 0.0   ;;  %vm1385_vm0 = vmmov 0   ;;  %v1114_v1 = vld [vmem:[#allocation7 + $0x38] sm:$0xff]   ;;  %v1115_v2 = vld [vmem:[#allocation7 + $0x30] sm:$0xff]   ;;  %v159_v31 = vlaneseq }
  0x63   :  { %998 = vmatprep.subr.bf16.mxu0 %v1384_v0  ;;  %1014 = vmatprep.mubr.msk.bf16.mxu0 %vm1385_vm0, %v1384_v0  ;;  %v1116_v3 = vld [vmem:[#allocation7 + $0x28] sm:$0xff]   ;;  %v1122_v4 = vld [vmem:[#allocation8 + $0x38] sm:$0xff]   ;;  %v1117_v5 = vld [vmem:[#allocation7 + $0x20] sm:$0xff]   ;;  %v1386_v49 = vmov 0  }
  0x64   :  { %1018 = vmatprep.subr.bf16.mxu1 %v1384_v0  ;;  %1034 = vmatprep.mubr.msk.bf16.mxu1 %vm1385_vm0, %v1384_v0  ;;  %v1123_v6 = vld [vmem:[#allocation8 + $0x30] sm:$0xff]   ;;  %v1118_v7 = vld [vmem:[#allocation7 + $0x18] sm:$0xff]   ;;  %v1124_v8 = vld [vmem:[#allocation8 + $0x28] sm:$0xff]   ;;  %v1498_v32 = vshrl.u32 %v159_v31, 7 }
  0x65   :  { %999 = vmatpush3.bf16.msra.mxu0 %v1114_v1  ;;  %1019 = vmatpush3.bf16.msra.mxu1 %v1122_v4  ;;  %v1119_v9 = vld [vmem:[#allocation7 + $0x10] sm:$0xff]   ;;  %v1125_v10 = vld [vmem:[#allocation8 + $0x20] sm:$0xff]   ;;  %v1120_v11 = vld [vmem:[#allocation7 + $0x8] sm:$0xff]  }
  0x66   :  { %1000 = vmatprep.subr.bf16.mxu0 %v1384_v0  ;;  %1020 = vmatprep.subr.bf16.mxu1 %v1384_v0  ;;  %v1126_v12 = vld [vmem:[#allocation8 + $0x18] sm:$0xff]   ;;  %v1121_v13 = vld [vmem:[#allocation7] sm:$0xff]   ;;  %v140_v14 = vld [vmem:[#allocation2] sm:$0xff]  ;;  %v1507_v35 = vsub.s32 0, %v1498_v32 }
  0x67   :  { %v1127_v15 = vld [vmem:[#allocation8 + $0x10] sm:$0xff]   ;;  %v141_v16 = vpack.c.bf16 %v140_v14, %v140_v14  ;;  %v1128_v17 = vld [vmem:[#allocation8 + $0x8] sm:$0xff]   ;;  %v1129_v18 = vld [vmem:[#allocation8] sm:$0xff]  }
  0x68   :  { %v1130_v19 = vld [vmem:[#allocation10 + $0x70] ss:$8 sps:$4 sm:$0xff]   ;;  %v1132_v20 = vld [vmem:[#allocation10 + $0x74] ss:$8 sps:$4 sm:$0xff]   ;;  %v1135_v21 = vld [vmem:[#allocation10 + $0x64] ss:$8 sps:$4 sm:$0xff]  }
  0x69   :  { %1001 = vmatpush3.bf16.msra.mxu0 %v1115_v2  ;;  %1021 = vmatpush3.bf16.msra.mxu1 %v1123_v6  ;;  %v1133_v22 = vld [vmem:[#allocation10 + $0x60] ss:$8 sps:$4 sm:$0xff]   ;;  %v1138_v23 = vld [vmem:[#allocation10 + $0x54] ss:$8 sps:$4 sm:$0xff]   ;;  %v1136_v24 = vld [vmem:[#allocation10 + $0x50] ss:$8 sps:$4 sm:$0xff]  }
  0x6a   :  { %1002 = vmatprep.subr.bf16.mxu0 %v1384_v0  ;;  %1022 = vmatprep.subr.bf16.mxu1 %v1384_v0  ;;  %v1141_v25 = vld [vmem:[#allocation10 + $0x44] ss:$8 sps:$4 sm:$0xff]   ;;  %v1139_v26 = vld [vmem:[#allocation10 + $0x40] ss:$8 sps:$4 sm:$0xff]   ;;  %v1144_v27 = vld [vmem:[#allocation10 + $0x34] ss:$8 sps:$4 sm:$0xff]  }
  0x6b   :  { %v1142_v28 = vld [vmem:[#allocation10 + $0x30] ss:$8 sps:$4 sm:$0xff]   ;;  %v1147_v29 = vld [vmem:[#allocation10 + $0x24] ss:$8 sps:$4 sm:$0xff]   ;;  %v1145_v30 = vld [vmem:[#allocation10 + $0x20] ss:$8 sps:$4 sm:$0xff]  }
  0x6c   :  { %v1503_v33 = vld [vmem:[%s1563_s8] sm:$0x7f]  ;;  %v1153_v47 = vld [vmem:[#allocation10 + $0x4] ss:$8 sps:$4 sm:$0xff]   ;;  %v1151_v48 = vld [vmem:[#allocation10] ss:$8 sps:$4 sm:$0xff]  }
  0x6d   :  { %1003 = vmatpush3.bf16.msra.mxu0 %v1116_v3  ;;  %1023 = vmatpush3.bf16.msra.mxu1 %v1124_v8  ;;  %v158_v34 = vunpack.c.l.bf16 %v1503_v33  ;;  %v1150_v45 = vld [vmem:[#allocation10 + $0x14] ss:$8 sps:$4 sm:$0xff]   ;;  %v1148_v46 = vld [vmem:[#allocation10 + $0x10] ss:$8 sps:$4 sm:$0xff]   ;;  %v272_v52 = vrot.slane %v1503_v33, 1  ;;  %v1156_v63 = vld [vmem:[#allocation11 + $0x28] sm:$0xff]  }
  0x6e   :  { %1004 = vmatprep.subr.bf16.mxu0 %v1384_v0  ;;  %1024 = vmatprep.subr.bf16.mxu1 %v1384_v0  ;;  %v1154_v50 = vld [vmem:[#allocation11 + $0x38] sm:$0xff]   ;;  %v1155_v51 = vld [vmem:[#allocation11 + $0x30] sm:$0xff]   ;;  %v1157_v1 = vld [vmem:[#allocation11 + $0x20] sm:$0xff]   ;;  %s1387_s8 = smov [#allocation16]  }
  0x6f   :  { %v162_v36 = vrot.slane %v158_v34, %v1507_v35  ;;  %v274_v53 = vunpack.c.l.bf16 %v272_v52  ;;  %v1158_v2 = vld [vmem:[#allocation11 + $0x18] sm:$0xff]   ;;  %v1159_v3 = vld [vmem:[#allocation11 + $0x10] sm:$0xff]   ;;  %v1160_v4 = vld [vmem:[#allocation11 + $0x8] sm:$0xff]   ;;  %s884_s19 = sshll.u32 %s1387_s8, 4  ;;  %s885_s19 = int_to_ptr.vmem [resolvable:$true] %s884_s19 }
  0x70   :  { %v1162_v6 = vld [vmem:[#allocation13 + $0x38] sm:$0xff]   ;;  %v1164_v8 = vld [vmem:[#allocation13 + $0x28] sm:$0xff]   ;;  %v1169_v34 = vld [vmem:[#allocation13] sm:$0xff]   ;;  %s1340_s20 = scalar_lea.vmem %s885_s19, 128  ;;  %p1345_p13 = scmp.lt.s32.totalorder %s885_s19, %s885_s19 }
  0x71   :  { %1005 = vmatpush3.bf16.msra.mxu0 %v1117_v5  ;;  %1025 = vmatpush3.bf16.msra.mxu1 %v1125_v10  ;;  %v278_v54 = vrot.slane %v274_v53, %v1507_v35  ;;  %v1161_v5 = vld [vmem:[#allocation11] sm:$0xff]   ;;  %v1166_v10 = vld [vmem:[#allocation13 + $0x18] sm:$0xff]   ;;  %v1168_v31 = vld [vmem:[#allocation13 + $0x8] sm:$0xff]   ;;  %p1341_p12 = scmp.ne.s32.totalorder %s885_s19, %s1340_s20  ;;  %p1346_p0 = scmp.lt.s32.totalorder %s1340_s20, %s1340_s20 }
  0x72   :  { %1006 = vmatprep.subr.bf16.mxu0 %v1384_v0  ;;  %1026 = vmatprep.subr.bf16.mxu1 %v1384_v0  ;;  %v1176_v52 = vld [vmem:[#allocation14 + $0x8] sm:$0xff]   ;;  %v1177_v53 = vld [vmem:[#allocation14] sm:$0xff]  }
  0x73   :  { %p1347_p1 = por %p1346_p0, %p1345_p13 }
  0x75   :  { %1007 = vmatpush3.bf16.msra.mxu0 %v1118_v7  ;;  %1027 = vmatpush3.bf16.msra.mxu1 %v1126_v12  ;;  %v1163_v7 = vld [vmem:[#allocation13 + $0x30] sm:$0xff]   ;;  %v387_v12 = vrot.slane %v1503_v33, 2  ;;  %p1348_p2 = pnand %p1347_p1, %p1341_p12 }
  0x76   :  { %1008 = vmatprep.subr.bf16.mxu0 %v1384_v0  ;;  %1028 = vmatprep.subr.bf16.mxu1 %v1384_v0 }
  0x79   :  { %1009 = vmatpush3.bf16.msra.mxu0 %v1119_v9  ;;  %1029 = vmatpush3.bf16.msra.mxu1 %v1127_v15  ;;  %v1165_v9 = vld [vmem:[#allocation13 + $0x20] sm:$0xff]  }
  0x7a   :  { %1010 = vmatprep.subr.bf16.mxu0 %v1384_v0  ;;  %1030 = vmatprep.subr.bf16.mxu1 %v1384_v0 }
  0x7d   :  { %1011 = vmatpush3.bf16.msra.mxu0 %v1120_v11  ;;  %1031 = vmatpush3.bf16.msra.mxu1 %v1128_v17  ;;  %v1167_v11 = vld [vmem:[#allocation13 + $0x10] sm:$0xff]  }
  0x7e   :  { %1012 = vmatprep.subr.bf16.mxu0 %v1384_v0  ;;  %1032 = vmatprep.subr.bf16.mxu1 %v1384_v0 }
  0x81   :  { %1013 = vmatpush3.bf16.msra.mxu0 %v1121_v13  ;;  %1033 = vmatpush3.bf16.msra.mxu1 %v1129_v18  ;;  %v389_v13 = vunpack.c.l.bf16 %v387_v12 }
  0x82   :  { %1038 = vmatprep.subr.bf16.mxu1 %v1384_v0  ;;  %489 = vmatprep.subr.bf16.mxu0 %v1132_v20 }
  0x83   :  { %v394_v14 = vrot.slane %v389_v13, %v1507_v35 }
  0x84   :  { %1015 = vmatmul.mubr.bf16.vlgmr.msra.gmra.mxu0 %v141_v16 }
  0x85   :  { %490 = vmatpush1.bf16.msra.mxu0 %v1130_v19  ;;  %521 = vmatprep.mubr.bf16.mxu0 %v1386_v49  ;;  %v404_v15 = vrot.slane %v394_v14, %v1507_v35 }
  0x86   :  { %491 = vmatprep.subr.bf16.mxu0 %v1135_v21 }
  0x89   :  { %492 = vmatpush1.bf16.msra.mxu0 %v1133_v22  ;;  %v397_v22 = vsub.s32 2, %v1498_v32  ;;  %v1170_v32 = vld [vmem:[#allocation14 + $0x38] sm:$0xff]  }
  0x8a   :  { %493 = vmatprep.subr.bf16.mxu0 %v1138_v23 }
  0x8b   :  { %v398_v23 = vrot.slane %v389_v13, %v397_v22 }
  0x8d   :  { %494 = vmatpush1.bf16.msra.mxu0 %v1136_v24  ;;  %v408_v24 = vrot.slane %v398_v23, %v1507_v35 }
  0x8e   :  { %495 = vmatprep.subr.bf16.mxu0 %v1141_v25  ;;  %v532_v25 = vld [vmem:[#allocation5] sm:$0xff] }
  0x91   :  { %496 = vmatpush1.bf16.msra.mxu0 %v1139_v26 }
  0x92   :  { %497 = vmatprep.subr.bf16.mxu0 %v1144_v27 }
  0x95   :  { %498 = vmatpush1.bf16.msra.mxu0 %v1142_v28 }
  0x96   :  { %499 = vmatprep.subr.bf16.mxu0 %v1147_v29 }
  0x99   :  { %500 = vmatpush1.bf16.msra.mxu0 %v1145_v30 }
  0x9a   :  { %501 = vmatprep.subr.bf16.mxu0 %v1150_v45 }
  0x9d   :  { %502 = vmatpush1.bf16.msra.mxu0 %v1148_v46 }
  0x9e   :  { %503 = vmatprep.subr.bf16.mxu0 %v1153_v47 }
  0xa1   :  { %504 = vmatpush1.bf16.msra.mxu0 %v1151_v48 }
  0xa2   :  { %1058 = vmatprep.subr.bf16.mxu0 %v1384_v0 }
 0x144   :  { %v245_v37 = vpop.f32.mrf.mxu0 }
 0x145   :  { %v246_v38 = vadd.f32 %v245_v37, %v162_v36  ;;  %v1171_v36 = vld [vmem:[#allocation14 + $0x30] sm:$0xff]   ;;  %v1172_v37 = vld [vmem:[#allocation14 + $0x28] sm:$0xff]  }
 0x146   :  { %v1016_v39 = vpop.f32.mrf.mxu0 }
 0x147   :  { %vm251_vm1 = vcmp.gt.f32.partialorder %v246_v38, 0.0  ;;  %v252_v40 = vmul.f32 0.01, %v246_v38  ;;  %v1174_v39 = vld [vmem:[#allocation14 + $0x18] sm:$0xff]  }
 0x148   :  { %v248_v41 = vpop.f32.mrf.mxu0 }
 0x149   :  { %v253_v42 = vsel %vm251_vm1, %v246_v38, %v252_v40  ;;  %v1173_v38 = vld [vmem:[#allocation14 + $0x20] sm:$0xff]   ;;  %v1175_v40 = vld [vmem:[#allocation14 + $0x10] sm:$0xff]   ;;  %v552_v41 = vrot.slane %v1503_v33, 4 }
 0x14a   :  { %v1017_v43 = vpop.f32.mrf.mxu0  ;;  %v254_v44 = vpack.c.bf16 %v253_v42, %v253_v42 }
 0x14b   :  { %v554_v42 = vunpack.c.l.bf16 %v552_v41 }
 0x14c   :  { %1035 = vmatmul.mubr.bf16.vlgmr.msra.gmra.mxu1 %v254_v44 }
 0x14d   :  { %1054 = vmatprep.mubr.msk.bf16.mxu1 %vm1385_vm0, %v1384_v0  ;;  %1039 = vmatpush3.bf16.msra.mxu1 %v1154_v50  ;;  %v558_v43 = vrot.slane %v554_v42, %v1507_v35 }
 0x14e   :  { %1040 = vmatprep.subr.bf16.mxu1 %v1384_v0 }
 0x151   :  { %1041 = vmatpush3.bf16.msra.mxu1 %v1155_v51 }
 0x152   :  { %1042 = vmatprep.subr.bf16.mxu1 %v1384_v0 }
 0x155   :  { %1043 = vmatpush3.bf16.msra.mxu1 %v1156_v63 }
 0x156   :  { %1044 = vmatprep.subr.bf16.mxu1 %v1384_v0 }
 0x159   :  { %1045 = vmatpush3.bf16.msra.mxu1 %v1157_v1 }
 0x15a   :  { %1046 = vmatprep.subr.bf16.mxu1 %v1384_v0 }
 0x15d   :  { %1047 = vmatpush3.bf16.msra.mxu1 %v1158_v2  ;;  %v782_v2 = vrot.slane %v1503_v33, 6 }
 0x15e   :  { %1048 = vmatprep.subr.bf16.mxu1 %v1384_v0 }
 0x161   :  { %1049 = vmatpush3.bf16.msra.mxu1 %v1159_v3 }
 0x162   :  { %1050 = vmatprep.subr.bf16.mxu1 %v1384_v0 }
 0x165   :  { %1051 = vmatpush3.bf16.msra.mxu1 %v1160_v4 }
 0x166   :  { %1052 = vmatprep.subr.bf16.mxu1 %v1384_v0 }
 0x169   :  { %1053 = vmatpush3.bf16.msra.mxu1 %v1161_v5 }
 0x16a   :  { %1078 = vmatprep.subr.bf16.mxu1 %v1384_v0 }
 0x20c   :  { %v361_v55 = vpop.f32.mrf.mxu1 }
 0x20d   :  { %v362_v56 = vadd.f32 %v361_v55, %v278_v54  ;;  %v667_v54 = vrot.slane %v1503_v33, 5 }
 0x20e   :  { %v1036_v57 = vpop.f32.mrf.mxu1 }
 0x20f   :  { %vm367_vm2 = vcmp.gt.f32.partialorder %v362_v56, 0.0  ;;  %v368_v58 = vmul.f32 0.01, %v362_v56  ;;  %v669_v55 = vunpack.c.l.bf16 %v667_v54 }
 0x210   :  { %v364_v59 = vpop.f32.mrf.mxu1 }
 0x211   :  { %v369_v60 = vsel %vm367_vm2, %v362_v56, %v368_v58  ;;  %v673_v56 = vrot.slane %v669_v55, %v1507_v35 }
 0x212   :  { %v370_v61 = vpack.c.bf16 %v369_v60, %v369_v60  ;;  %v1037_v62 = vpop.f32.mrf.mxu1 }
 0x214   :  { %522 = vmatmul.mubr.bf16.vlgmr.msra.gmra.mxu0 %v370_v61 }
 0x215   :  { %1074 = vmatprep.mubr.msk.bf16.mxu0 %vm1385_vm0, %v1384_v0  ;;  %1059 = vmatpush3.bf16.msra.mxu0 %v1162_v6 }
 0x216   :  { %1060 = vmatprep.subr.bf16.mxu0 %v1384_v0 }
 0x219   :  { %1061 = vmatpush3.bf16.msra.mxu0 %v1163_v7 }
 0x21a   :  { %1062 = vmatprep.subr.bf16.mxu0 %v1384_v0 }
 0x21d   :  { %1063 = vmatpush3.bf16.msra.mxu0 %v1164_v8 }
 0x21e   :  { %1064 = vmatprep.subr.bf16.mxu0 %v1384_v0 }
 0x221   :  { %1065 = vmatpush3.bf16.msra.mxu0 %v1165_v9 }
 0x222   :  { %1066 = vmatprep.subr.bf16.mxu0 %v1384_v0 }
 0x225   :  { %1067 = vmatpush3.bf16.msra.mxu0 %v1166_v10 }
 0x226   :  { %1068 = vmatprep.subr.bf16.mxu0 %v1384_v0 }
 0x229   :  { %1069 = vmatpush3.bf16.msra.mxu0 %v1167_v11 }
 0x22a   :  { %1070 = vmatprep.subr.bf16.mxu0 %v1384_v0 }
 0x22d   :  { %1071 = vmatpush3.bf16.msra.mxu0 %v1168_v31 }
 0x22e   :  { %1072 = vmatprep.subr.bf16.mxu0 %v1384_v0 }
 0x231   :  { %1073 = vmatpush3.bf16.msra.mxu0 %v1169_v34 }
 0x2d4   :  { %v523_v16 = vpop.f32.mrf.mxu0 }
 0x2d5   :  { %v524_v17 = vadd.f32 %v523_v16, %v404_v15 }
 0x2d6   :  { %v525_v18 = vpop.f32.mrf.mxu0 }
 0x2d7   :  { %v530_v19 = vmul.f32 1.442695, %v524_v17  ;;  %v526_v27 = vadd.f32 %v525_v18, %v408_v24 }
 0x2d8   :  { %v527_v20 = vpop.f32.mrf.mxu0 }
 0x2d9   :  { %1178 = vpow2.f32 %v530_v19 }
 0x2da   :  { %v528_v21 = vpop.f32.mrf.mxu0 }
 0x2e6   :  { %v1179_v26 = vpop.eup %1178 }
 0x2e7   :  { %v533_v28 = vmul.f32 %v1179_v26, %v532_v25 }
 0x2e9   :  { %v534_v29 = vadd.f32 %v533_v28, %v526_v27 }
 0x2eb   :  { %v535_v30 = vpack.c.bf16 %v534_v29, %v534_v29 }
 0x2ed   :  { %1055 = vmatmul.mubr.bf16.vlgmr.msra.gmra.mxu1 %v535_v30 }
 0x2ee   :  { %1094 = vmatprep.mubr.msk.bf16.mxu1 %vm1385_vm0, %v1384_v0  ;;  %1079 = vmatpush3.bf16.msra.mxu1 %v1170_v32 }
 0x2ef   :  { %1080 = vmatprep.subr.bf16.mxu1 %v1384_v0 }
 0x2f2   :  { %1081 = vmatpush3.bf16.msra.mxu1 %v1171_v36 }
 0x2f3   :  { %1082 = vmatprep.subr.bf16.mxu1 %v1384_v0 }
 0x2f6   :  { %1083 = vmatpush3.bf16.msra.mxu1 %v1172_v37 }
 0x2f7   :  { %1084 = vmatprep.subr.bf16.mxu1 %v1384_v0 }
 0x2fa   :  { %1085 = vmatpush3.bf16.msra.mxu1 %v1173_v38 }
 0x2fb   :  { %1086 = vmatprep.subr.bf16.mxu1 %v1384_v0 }
 0x2fe   :  { %1087 = vmatpush3.bf16.msra.mxu1 %v1174_v39 }
 0x2ff   :  { %1088 = vmatprep.subr.bf16.mxu1 %v1384_v0 }
 0x302   :  { %1089 = vmatpush3.bf16.msra.mxu1 %v1175_v40 }
 0x303   :  { %1090 = vmatprep.subr.bf16.mxu1 %v1384_v0 }
 0x306   :  { %1091 = vmatpush3.bf16.msra.mxu1 %v1176_v52 }
 0x307   :  { %1092 = vmatprep.subr.bf16.mxu1 %v1384_v0  ;;  %v784_v0 = vunpack.c.l.bf16 %v782_v2 }
 0x309   :  { %v788_v3 = vrot.slane %v784_v0, %v1507_v35 }
 0x30a   :  { %1093 = vmatpush3.bf16.msra.mxu1 %v1177_v53 }
 0x3ad   :  { %v641_v44 = vpop.f32.mrf.mxu1 }
 0x3ae   :  { %v642_v45 = vadd.f32 %v641_v44, %v558_v43 }
 0x3af   :  { %v1056_v46 = vpop.f32.mrf.mxu1 }
 0x3b0   :  { %vm647_vm3 = vcmp.gt.f32.partialorder %v642_v45, 0.0  ;;  %v648_v47 = vmul.f32 0.01, %v642_v45 }
 0x3b1   :  { %v644_v48 = vpop.f32.mrf.mxu1 }
 0x3b2   :  { %v649_v49 = vsel %vm647_vm3, %v642_v45, %v648_v47 }
 0x3b3   :  { %v650_v50 = vpack.c.bf16 %v649_v49, %v649_v49  ;;  %v1057_v51 = vpop.f32.mrf.mxu1 }
 0x3b5   :  { %1075 = vmatmul.mubr.bf16.vlgmr.msra.gmra.mxu0 %v650_v50 }
 0x475   :  { %v756_v57 = vpop.f32.mrf.mxu0 }
 0x476   :  { %v757_v58 = vadd.f32 %v756_v57, %v673_v56 }
 0x477   :  { %v1076_v59 = vpop.f32.mrf.mxu0 }
 0x478   :  { %vm762_vm4 = vcmp.gt.f32.partialorder %v757_v58, 0.0  ;;  %v763_v60 = vmul.f32 0.01, %v757_v58 }
 0x479   :  { %v759_v61 = vpop.f32.mrf.mxu0 }
 0x47a   :  { %v764_v62 = vsel %vm762_vm4, %v757_v58, %v763_v60 }
 0x47b   :  { %v765_v63 = vpack.c.bf16 %v764_v62, %v764_v62  ;;  %v1077_v1 = vpop.f32.mrf.mxu0 }
 0x47d   :  { %1095 = vmatmul.mubr.bf16.vlgmr.msra.gmra.mxu1 %v765_v63 }
 0x53d   :  { %v871_v4 = vpop.f32.mrf.mxu1 }
 0x53e   :  { %v872_v5 = vadd.f32 %v871_v4, %v788_v3 }
 0x53f   :  { %v1096_v6 = vpop.f32.mrf.mxu1 }
 0x540   :  { %877 = vst [vmem:[#allocation16] sm:$0xff] %v872_v5 }
 0x541   :  { %v874_v7 = vpop.f32.mrf.mxu1 }
 0x542   :  { %1351 = shalt.err (!%p1348_p2)
}
 0x543   :  { %887 = dma.vmem_to_hbm [thread:$0]  %s885_s19, 128, %s1564_s9, [#allocation4]   ;;  %v1097_v33 = vpop.f32.mrf.mxu1 }
 0x544   :  { %1370 = dma.done.wait [#allocation4], 128  }
 0x545   :  { %1371 = vsyncadd [#allocation4], 4294967168 }
 0x546   :  { %891 = vsyncpa [#allocation3], 1 }
 0x547   :  { %892 = vsyncpa [#allocation6], 1 }
 0x548   :  { %893 = vsyncpa [#allocation9], 1 }
 0x549   :  { %894 = vsyncpa [#allocation12], 1 }
 0x54a   :  { %895 = vsyncpa [#allocation15], 1 }
 0x54b   :  { %896 = vsyncpa [#allocation4], 1 }

// kernel: tpu_custom_call.1
= control target key start
LH: loop header
LB: loop body
LE: loop exit
PB: predicated region body
PF: predicated region fallthrough
CT: control target
= control target key end

     0   :  { %14 = vsyncpa [#allocation3], 0  ;;  %s1555_s0 = inlined_call_operand.hbm [shape: f32[8,128], index: 0, kind: input, shape index: {}]   ;;  %s1556_s1 = inlined_call_operand.hbm [shape: f32[8,128], index: 1, kind: input, shape index: {}]   ;;  %s1557_s2 = inlined_call_operand.hbm [shape: bf16[128,128], index: 2, kind: input, shape index: {}]   ;;  %s1558_s3 = inlined_call_operand.hbm [shape: bf16[128,128], index: 3, kind: input, shape index: {}]   ;;  %s1559_s4 = inlined_call_operand.hbm [shape: bf16[128,256], index: 4, kind: input, shape index: {}]   ;;  %s1560_s5 = inlined_call_operand.hbm [shape: bf16[128,128], index: 5, kind: input, shape index: {}]   ;;  %s1561_s6 = inlined_call_operand.hbm [shape: bf16[128,128], index: 6, kind: input, shape index: {}]   ;;  %s1562_s7 = inlined_call_operand.hbm [shape: bf16[128,128], index: 7, kind: input, shape index: {}]   ;;  %s1563_s8 = inlined_call_operand.vmem [shape: bf16[1,896], index: 8, kind: input, shape index: {}]   ;;  %s1564_s9 = inlined_call_operand.hbm [shape: f32[8,128], index: 9, kind: output, shape index: {}]  }
   0x1   :  { %15 = vsyncpa [#allocation6], 0 }
   0x2   :  { %16 = vsyncpa [#allocation9], 0 }
   0x3   :  { %17 = vsyncpa [#allocation12], 0 }
   0x4   :  { %18 = vsyncpa [#allocation15], 0 }
   0x5   :  { %19 = vsyncpa [#allocation4], 0  ;;  %s1372_s30 = smov [#allocation5]  }
   0x6   :  { %s36_s10 = sshll.u32 %s1372_s30, 4  ;;  %s37_s10 = int_to_ptr.vmem [resolvable:$true] %s36_s10 }
   0x7   :  { %s1188_s11 = scalar_lea.vmem %s37_s10, 128  ;;  %p1193_p1 = scmp.lt.s32.totalorder %s37_s10, %s37_s10 }
   0x8   :  { %p1189_p0 = scmp.ne.s32.totalorder %s37_s10, %s1188_s11  ;;  %p1194_p2 = scmp.lt.s32.totalorder %s1188_s11, %s1188_s11 }
   0xa   :  { %p1195_p3 = por %p1194_p2, %p1193_p1 }
   0xc   :  { %p1196_p4 = pnand %p1195_p3, %p1189_p0 }
   0xe   :  { %1199 = shalt.err (!%p1196_p4)
}
   0xf   :  { %39 = dma.hbm_to_vmem [thread:$0]  %s1556_s1, 128, %s37_s10, [#allocation6]  }
  0x10   :  { %s1373_s14 = smov [#allocation8]   ;;  %s1374_s16 = smov [#allocation11]  }
  0x11   :  { %s57_s15 = sshll.u32 %s1373_s14, 4  ;;  %s81_s17 = sshll.u32 %s1374_s16, 4  ;;  %s58_s15 = int_to_ptr.vmem [resolvable:$true] %s57_s15  ;;  %s82_s17 = int_to_ptr.vmem [resolvable:$true] %s81_s17 }
  0x12   :  { %s1208_s18 = scalar_lea.vmem %s58_s15, 1024  ;;  %p1213_p6 = scmp.lt.s32.totalorder %s58_s15, %s58_s15 }
  0x13   :  { %p1209_p5 = scmp.ne.s32.totalorder %s58_s15, %s1208_s18  ;;  %p1214_p7 = scmp.lt.s32.totalorder %s1208_s18, %s1208_s18 }
  0x15   :  { %p1215_p8 = por %p1214_p7, %p1213_p6 }
  0x17   :  { %p1216_p9 = pnand %p1215_p8, %p1209_p5 }
  0x19   :  { %1219 = shalt.err (!%p1216_p9)
}
  0x1a   :  { %s1375_s19 = smov 64   ;;  %s1376_s20 = smov 4  }
  0x1b   :  { %63 = dma.hbm_to_vmem [thread:$0]  %s1558_s3, 1024, %s58_s15, [#allocation9], %s1375_s19, %s1375_s19, %s1376_s20  }
  0x1c   :  { %s1228_s1 = scalar_lea.vmem %s82_s17, 1024  ;;  %p1233_p11 = scmp.lt.s32.totalorder %s82_s17, %s82_s17 }
  0x1d   :  { %p1229_p10 = scmp.ne.s32.totalorder %s82_s17, %s1228_s1  ;;  %p1234_p12 = scmp.lt.s32.totalorder %s1228_s1, %s1228_s1 }
  0x1f   :  { %p1235_p13 = por %p1234_p12, %p1233_p11 }
  0x21   :  { %p1236_p0 = pnand %p1235_p13, %p1229_p10 }
  0x23   :  { %1239 = shalt.err (!%p1236_p0)
}
  0x24   :  { %87 = dma.hbm_to_vmem [thread:$0]  %s1560_s5, 1024, %s82_s17, [#allocation12], %s1375_s19, %s1375_s19, %s1376_s20  }
  0x25   :  { %s1377_s25 = smov [#allocation2]   ;;  %s1378_s27 = smov [#allocation7]  }
  0x26   :  { %s26_s26 = sshll.u32 %s1377_s25, 4  ;;  %s45_s3 = sshll.u32 %s1378_s27, 4  ;;  %s27_s26 = int_to_ptr.vmem [resolvable:$true] %s26_s26  ;;  %s46_s3 = int_to_ptr.vmem [resolvable:$true] %s45_s3 }
  0x27   :  { %s1248_s28 = scalar_lea.vmem %s27_s26, 128  ;;  %p1253_p2 = scmp.lt.s32.totalorder %s27_s26, %s27_s26 }
  0x28   :  { %p1249_p1 = scmp.ne.s32.totalorder %s27_s26, %s1248_s28  ;;  %p1254_p3 = scmp.lt.s32.totalorder %s1248_s28, %s1248_s28 }
  0x2a   :  { %p1255_p4 = por %p1254_p3, %p1253_p2 }
  0x2c   :  { %p1256_p5 = pnand %p1255_p4, %p1249_p1 }
  0x2e   :  { %1259 = shalt.err (!%p1256_p5)
}
  0x2f   :  { %29 = dma.hbm_to_vmem [thread:$0]  %s1555_s0, 128, %s27_s26, [#allocation3]  }
  0x30   :  { %s1268_s10 = scalar_lea.vmem %s46_s3, 1024  ;;  %p1273_p7 = scmp.lt.s32.totalorder %s46_s3, %s46_s3 }
  0x31   :  { %p1269_p6 = scmp.ne.s32.totalorder %s46_s3, %s1268_s10  ;;  %p1274_p8 = scmp.lt.s32.totalorder %s1268_s10, %s1268_s10 }
  0x33   :  { %p1275_p9 = por %p1274_p8, %p1273_p7 }
  0x35   :  { %p1276_p10 = pnand %p1275_p9, %p1269_p6 }
  0x37   :  { %1279 = shalt.err (!%p1276_p10)
}
  0x38   :  { %51 = dma.hbm_to_vmem [thread:$0]  %s1557_s2, 1024, %s46_s3, [#allocation6], %s1375_s19, %s1375_s19, %s1376_s20  }
  0x39   :  { %s1379_s12 = smov [#allocation10]  }
  0x3a   :  { %s69_s13 = sshll.u32 %s1379_s12, 4  ;;  %s70_s13 = int_to_ptr.vmem [resolvable:$true] %s69_s13 }
  0x3b   :  { %s1288_s14 = scalar_lea.vmem %s70_s13, 2048  ;;  %p1293_p12 = scmp.lt.s32.totalorder %s70_s13, %s70_s13 }
  0x3c   :  { %p1289_p11 = scmp.ne.s32.totalorder %s70_s13, %s1288_s14  ;;  %p1294_p13 = scmp.lt.s32.totalorder %s1288_s14, %s1288_s14 }
  0x3e   :  { %p1295_p0 = por %p1294_p13, %p1293_p12 }
  0x40   :  { %p1296_p1 = pnand %p1295_p0, %p1289_p11 }
  0x42   :  { %1299 = shalt.err (!%p1296_p1)
}
  0x43   :  { %s1380_s0 = smov 128   ;;  %s1381_s15 = smov 8  }
  0x44   :  { %75 = dma.hbm_to_vmem [thread:$0]  %s1559_s4, 2048, %s70_s13, [#allocation9], %s1380_s0, %s1380_s0, %s1381_s15  }
  0x45   :  { %s1382_s18 = smov [#allocation13]   ;;  %s1383_s22 = smov [#allocation14]  }
  0x46   :  { %s93_s21 = sshll.u32 %s1382_s18, 4  ;;  %s105_s2 = sshll.u32 %s1383_s22, 4  ;;  %s94_s21 = int_to_ptr.vmem [resolvable:$true] %s93_s21  ;;  %s106_s2 = int_to_ptr.vmem [resolvable:$true] %s105_s2 }
  0x47   :  { %s1308_s1 = scalar_lea.vmem %s94_s21, 1024  ;;  %p1313_p3 = scmp.lt.s32.totalorder %s94_s21, %s94_s21 }
  0x48   :  { %p1309_p2 = scmp.ne.s32.totalorder %s94_s21, %s1308_s1  ;;  %p1314_p4 = scmp.lt.s32.totalorder %s1308_s1, %s1308_s1 }
  0x4a   :  { %p1315_p5 = por %p1314_p4, %p1313_p3 }
  0x4c   :  { %p1316_p6 = pnand %p1315_p5, %p1309_p2 }
  0x4e   :  { %1319 = shalt.err (!%p1316_p6)
}
  0x4f   :  { %99 = dma.hbm_to_vmem [thread:$0]  %s1561_s6, 1024, %s94_s21, [#allocation12], %s1375_s19, %s1375_s19, %s1376_s20  }
  0x50   :  { %s1328_s4 = scalar_lea.vmem %s106_s2, 1024  ;;  %p1333_p8 = scmp.lt.s32.totalorder %s106_s2, %s106_s2 }
  0x51   :  { %p1329_p7 = scmp.ne.s32.totalorder %s106_s2, %s1328_s4  ;;  %p1334_p9 = scmp.lt.s32.totalorder %s1328_s4, %s1328_s4 }
  0x53   :  { %p1335_p10 = por %p1334_p9, %p1333_p8 }
  0x55   :  { %p1336_p11 = pnand %p1335_p10, %p1329_p7 }
  0x57   :  { %1339 = shalt.err (!%p1336_p11)
}
  0x58   :  { %111 = dma.hbm_to_vmem [thread:$0]  %s1562_s7, 1024, %s106_s2, [#allocation15], %s1375_s19, %s1375_s19, %s1376_s20  }
  0x59   :  { %1360 = dma.done.wait [#allocation3], 128  }
  0x5a   :  { %1361 = vsyncadd [#allocation3], 4294967168 }
  0x5b   :  { %1362 = dma.done.wait [#allocation6], 1152  }
  0x5c   :  { %1363 = vsyncadd [#allocation6], 4294966144 }
  0x5d   :  { %1364 = dma.done.wait [#allocation9], 3072  }
  0x5e   :  { %1365 = vsyncadd [#allocation9], 4294964224 }
  0x5f   :  { %1366 = dma.done.wait [#allocation12], 2048  }
  0x60   :  { %1367 = vsyncadd [#allocation12], 4294965248 }
  0x61   :  { %1368 = dma.done.wait [#allocation15], 1024  }
  0x62   :  { %1369 = vsyncadd [#allocation15], 4294966272  ;;  %v1384_v0 = vmov 0.0   ;;  %vm1385_vm0 = vmmov 0   ;;  %v1114_v1 = vld [vmem:[#allocation7 + $0x38] sm:$0xff]   ;;  %v1115_v2 = vld [vmem:[#allocation7 + $0x30] sm:$0xff]   ;;  %v159_v31 = vlaneseq }
  0x63   :  { %998 = vmatprep.subr.bf16.mxu0 %v1384_v0  ;;  %1014 = vmatprep.mubr.msk.bf16.mxu0 %vm1385_vm0, %v1384_v0  ;;  %v1116_v3 = vld [vmem:[#allocation7 + $0x28] sm:$0xff]   ;;  %v1122_v4 = vld [vmem:[#allocation8 + $0x38] sm:$0xff]   ;;  %v1117_v5 = vld [vmem:[#allocation7 + $0x20] sm:$0xff]   ;;  %v1386_v49 = vmov 0  }
  0x64   :  { %1018 = vmatprep.subr.bf16.mxu1 %v1384_v0  ;;  %1034 = vmatprep.mubr.msk.bf16.mxu1 %vm1385_vm0, %v1384_v0  ;;  %v1123_v6 = vld [vmem:[#allocation8 + $0x30] sm:$0xff]   ;;  %v1118_v7 = vld [vmem:[#allocation7 + $0x18] sm:$0xff]   ;;  %v1124_v8 = vld [vmem:[#allocation8 + $0x28] sm:$0xff]   ;;  %v1498_v32 = vshrl.u32 %v159_v31, 7 }
  0x65   :  { %999 = vmatpush3.bf16.msra.mxu0 %v1114_v1  ;;  %1019 = vmatpush3.bf16.msra.mxu1 %v1122_v4  ;;  %v1119_v9 = vld [vmem:[#allocation7 + $0x10] sm:$0xff]   ;;  %v1125_v10 = vld [vmem:[#allocation8 + $0x20] sm:$0xff]   ;;  %v1120_v11 = vld [vmem:[#allocation7 + $0x8] sm:$0xff]  }
  0x66   :  { %1000 = vmatprep.subr.bf16.mxu0 %v1384_v0  ;;  %1020 = vmatprep.subr.bf16.mxu1 %v1384_v0  ;;  %v1126_v12 = vld [vmem:[#allocation8 + $0x18] sm:$0xff]   ;;  %v1121_v13 = vld [vmem:[#allocation7] sm:$0xff]   ;;  %v140_v14 = vld [vmem:[#allocation2] sm:$0xff]  ;;  %v1507_v35 = vsub.s32 0, %v1498_v32 }
  0x67   :  { %v1127_v15 = vld [vmem:[#allocation8 + $0x10] sm:$0xff]   ;;  %v141_v16 = vpack.c.bf16 %v140_v14, %v140_v14  ;;  %v1128_v17 = vld [vmem:[#allocation8 + $0x8] sm:$0xff]   ;;  %v1129_v18 = vld [vmem:[#allocation8] sm:$0xff]  }
  0x68   :  { %v1130_v19 = vld [vmem:[#allocation10 + $0x70] ss:$8 sps:$4 sm:$0xff]   ;;  %v1132_v20 = vld [vmem:[#allocation10 + $0x74] ss:$8 sps:$4 sm:$0xff]   ;;  %v1135_v21 = vld [vmem:[#allocation10 + $0x64] ss:$8 sps:$4 sm:$0xff]  }
  0x69   :  { %1001 = vmatpush3.bf16.msra.mxu0 %v1115_v2  ;;  %1021 = vmatpush3.bf16.msra.mxu1 %v1123_v6  ;;  %v1133_v22 = vld [vmem:[#allocation10 + $0x60] ss:$8 sps:$4 sm:$0xff]   ;;  %v1138_v23 = vld [vmem:[#allocation10 + $0x54] ss:$8 sps:$4 sm:$0xff]   ;;  %v1136_v24 = vld [vmem:[#allocation10 + $0x50] ss:$8 sps:$4 sm:$0xff]  }
  0x6a   :  { %1002 = vmatprep.subr.bf16.mxu0 %v1384_v0  ;;  %1022 = vmatprep.subr.bf16.mxu1 %v1384_v0  ;;  %v1141_v25 = vld [vmem:[#allocation10 + $0x44] ss:$8 sps:$4 sm:$0xff]   ;;  %v1139_v26 = vld [vmem:[#allocation10 + $0x40] ss:$8 sps:$4 sm:$0xff]   ;;  %v1144_v27 = vld [vmem:[#allocation10 + $0x34] ss:$8 sps:$4 sm:$0xff]  }
  0x6b   :  { %v1142_v28 = vld [vmem:[#allocation10 + $0x30] ss:$8 sps:$4 sm:$0xff]   ;;  %v1147_v29 = vld [vmem:[#allocation10 + $0x24] ss:$8 sps:$4 sm:$0xff]   ;;  %v1145_v30 = vld [vmem:[#allocation10 + $0x20] ss:$8 sps:$4 sm:$0xff]  }
  0x6c   :  { %v1503_v33 = vld [vmem:[%s1563_s8] sm:$0x7f]  ;;  %v1153_v47 = vld [vmem:[#allocation10 + $0x4] ss:$8 sps:$4 sm:$0xff]   ;;  %v1151_v48 = vld [vmem:[#allocation10] ss:$8 sps:$4 sm:$0xff]  }
  0x6d   :  { %1003 = vmatpush3.bf16.msra.mxu0 %v1116_v3  ;;  %1023 = vmatpush3.bf16.msra.mxu1 %v1124_v8  ;;  %v158_v34 = vunpack.c.l.bf16 %v1503_v33  ;;  %v1150_v45 = vld [vmem:[#allocation10 + $0x14] ss:$8 sps:$4 sm:$0xff]   ;;  %v1148_v46 = vld [vmem:[#allocation10 + $0x10] ss:$8 sps:$4 sm:$0xff]   ;;  %v272_v52 = vrot.slane %v1503_v33, 1  ;;  %v1156_v63 = vld [vmem:[#allocation11 + $0x28] sm:$0xff]  }
  0x6e   :  { %1004 = vmatprep.subr.bf16.mxu0 %v1384_v0  ;;  %1024 = vmatprep.subr.bf16.mxu1 %v1384_v0  ;;  %v1154_v50 = vld [vmem:[#allocation11 + $0x38] sm:$0xff]   ;;  %v1155_v51 = vld [vmem:[#allocation11 + $0x30] sm:$0xff]   ;;  %v1157_v1 = vld [vmem:[#allocation11 + $0x20] sm:$0xff]   ;;  %s1387_s8 = smov [#allocation16]  }
  0x6f   :  { %v162_v36 = vrot.slane %v158_v34, %v1507_v35  ;;  %v274_v53 = vunpack.c.l.bf16 %v272_v52  ;;  %v1158_v2 = vld [vmem:[#allocation11 + $0x18] sm:$0xff]   ;;  %v1159_v3 = vld [vmem:[#allocation11 + $0x10] sm:$0xff]   ;;  %v1160_v4 = vld [vmem:[#allocation11 + $0x8] sm:$0xff]   ;;  %s884_s19 = sshll.u32 %s1387_s8, 4  ;;  %s885_s19 = int_to_ptr.vmem [resolvable:$true] %s884_s19 }
  0x70   :  { %v1162_v6 = vld [vmem:[#allocation13 + $0x38] sm:$0xff]   ;;  %v1164_v8 = vld [vmem:[#allocation13 + $0x28] sm:$0xff]   ;;  %v1169_v34 = vld [vmem:[#allocation13] sm:$0xff]   ;;  %s1340_s20 = scalar_lea.vmem %s885_s19, 128  ;;  %p1345_p13 = scmp.lt.s32.totalorder %s885_s19, %s885_s19 }
  0x71   :  { %1005 = vmatpush3.bf16.msra.mxu0 %v1117_v5  ;;  %1025 = vmatpush3.bf16.msra.mxu1 %v1125_v10  ;;  %v278_v54 = vrot.slane %v274_v53, %v1507_v35  ;;  %v1161_v5 = vld [vmem:[#allocation11] sm:$0xff]   ;;  %v1166_v10 = vld [vmem:[#allocation13 + $0x18] sm:$0xff]   ;;  %v1168_v31 = vld [vmem:[#allocation13 + $0x8] sm:$0xff]   ;;  %p1341_p12 = scmp.ne.s32.totalorder %s885_s19, %s1340_s20  ;;  %p1346_p0 = scmp.lt.s32.totalorder %s1340_s20, %s1340_s20 }
  0x72   :  { %1006 = vmatprep.subr.bf16.mxu0 %v1384_v0  ;;  %1026 = vmatprep.subr.bf16.mxu1 %v1384_v0  ;;  %v1176_v52 = vld [vmem:[#allocation14 + $0x8] sm:$0xff]   ;;  %v1177_v53 = vld [vmem:[#allocation14] sm:$0xff]  }
  0x73   :  { %p1347_p1 = por %p1346_p0, %p1345_p13 }
  0x75   :  { %1007 = vmatpush3.bf16.msra.mxu0 %v1118_v7  ;;  %1027 = vmatpush3.bf16.msra.mxu1 %v1126_v12  ;;  %v1163_v7 = vld [vmem:[#allocation13 + $0x30] sm:$0xff]   ;;  %v387_v12 = vrot.slane %v1503_v33, 2  ;;  %p1348_p2 = pnand %p1347_p1, %p1341_p12 }
  0x76   :  { %1008 = vmatprep.subr.bf16.mxu0 %v1384_v0  ;;  %1028 = vmatprep.subr.bf16.mxu1 %v1384_v0 }
  0x79   :  { %1009 = vmatpush3.bf16.msra.mxu0 %v1119_v9  ;;  %1029 = vmatpush3.bf16.msra.mxu1 %v1127_v15  ;;  %v1165_v9 = vld [vmem:[#allocation13 + $0x20] sm:$0xff]  }
  0x7a   :  { %1010 = vmatprep.subr.bf16.mxu0 %v1384_v0  ;;  %1030 = vmatprep.subr.bf16.mxu1 %v1384_v0 }
  0x7d   :  { %1011 = vmatpush3.bf16.msra.mxu0 %v1120_v11  ;;  %1031 = vmatpush3.bf16.msra.mxu1 %v1128_v17  ;;  %v1167_v11 = vld [vmem:[#allocation13 + $0x10] sm:$0xff]  }
  0x7e   :  { %1012 = vmatprep.subr.bf16.mxu0 %v1384_v0  ;;  %1032 = vmatprep.subr.bf16.mxu1 %v1384_v0 }
  0x81   :  { %1013 = vmatpush3.bf16.msra.mxu0 %v1121_v13  ;;  %1033 = vmatpush3.bf16.msra.mxu1 %v1129_v18  ;;  %v389_v13 = vunpack.c.l.bf16 %v387_v12 }
  0x82   :  { %1038 = vmatprep.subr.bf16.mxu1 %v1384_v0  ;;  %489 = vmatprep.subr.bf16.mxu0 %v1132_v20 }
  0x83   :  { %v394_v14 = vrot.slane %v389_v13, %v1507_v35 }
  0x84   :  { %1015 = vmatmul.mubr.bf16.vlgmr.msra.gmra.mxu0 %v141_v16 }
  0x85   :  { %490 = vmatpush1.bf16.msra.mxu0 %v1130_v19  ;;  %521 = vmatprep.mubr.bf16.mxu0 %v1386_v49  ;;  %v404_v15 = vrot.slane %v394_v14, %v1507_v35 }
  0x86   :  { %491 = vmatprep.subr.bf16.mxu0 %v1135_v21 }
  0x89   :  { %492 = vmatpush1.bf16.msra.mxu0 %v1133_v22  ;;  %v397_v22 = vsub.s32 2, %v1498_v32  ;;  %v1170_v32 = vld [vmem:[#allocation14 + $0x38] sm:$0xff]  }
  0x8a   :  { %493 = vmatprep.subr.bf16.mxu0 %v1138_v23 }
  0x8b   :  { %v398_v23 = vrot.slane %v389_v13, %v397_v22 }
  0x8d   :  { %494 = vmatpush1.bf16.msra.mxu0 %v1136_v24  ;;  %v408_v24 = vrot.slane %v398_v23, %v1507_v35 }
  0x8e   :  { %495 = vmatprep.subr.bf16.mxu0 %v1141_v25  ;;  %v532_v25 = vld [vmem:[#allocation5] sm:$0xff] }
  0x91   :  { %496 = vmatpush1.bf16.msra.mxu0 %v1139_v26 }
  0x92   :  { %497 = vmatprep.subr.bf16.mxu0 %v1144_v27 }
  0x95   :  { %498 = vmatpush1.bf16.msra.mxu0 %v1142_v28 }
  0x96   :  { %499 = vmatprep.subr.bf16.mxu0 %v1147_v29 }
  0x99   :  { %500 = vmatpush1.bf16.msra.mxu0 %v1145_v30 }
  0x9a   :  { %501 = vmatprep.subr.bf16.mxu0 %v1150_v45 }
  0x9d   :  { %502 = vmatpush1.bf16.msra.mxu0 %v1148_v46 }
  0x9e   :  { %503 = vmatprep.subr.bf16.mxu0 %v1153_v47 }
  0xa1   :  { %504 = vmatpush1.bf16.msra.mxu0 %v1151_v48 }
  0xa2   :  { %1058 = vmatprep.subr.bf16.mxu0 %v1384_v0 }
 0x144   :  { %v245_v37 = vpop.f32.mrf.mxu0 }
 0x145   :  { %v246_v38 = vadd.f32 %v245_v37, %v162_v36  ;;  %v1171_v36 = vld [vmem:[#allocation14 + $0x30] sm:$0xff]   ;;  %v1172_v37 = vld [vmem:[#allocation14 + $0x28] sm:$0xff]  }
 0x146   :  { %v1016_v39 = vpop.f32.mrf.mxu0 }
 0x147   :  { %vm251_vm1 = vcmp.gt.f32.partialorder %v246_v38, 0.0  ;;  %v252_v40 = vmul.f32 0.01, %v246_v38  ;;  %v1174_v39 = vld [vmem:[#allocation14 + $0x18] sm:$0xff]  }
 0x148   :  { %v248_v41 = vpop.f32.mrf.mxu0 }
 0x149   :  { %v253_v42 = vsel %vm251_vm1, %v246_v38, %v252_v40  ;;  %v1173_v38 = vld [vmem:[#allocation14 + $0x20] sm:$0xff]   ;;  %v1175_v40 = vld [vmem:[#allocation14 + $0x10] sm:$0xff]   ;;  %v552_v41 = vrot.slane %v1503_v33, 4 }
 0x14a   :  { %v1017_v43 = vpop.f32.mrf.mxu0  ;;  %v254_v44 = vpack.c.bf16 %v253_v42, %v253_v42 }
 0x14b   :  { %v554_v42 = vunpack.c.l.bf16 %v552_v41 }
 0x14c   :  { %1035 = vmatmul.mubr.bf16.vlgmr.msra.gmra.mxu1 %v254_v44 }
 0x14d   :  { %1054 = vmatprep.mubr.msk.bf16.mxu1 %vm1385_vm0, %v1384_v0  ;;  %1039 = vmatpush3.bf16.msra.mxu1 %v1154_v50  ;;  %v558_v43 = vrot.slane %v554_v42, %v1507_v35 }
 0x14e   :  { %1040 = vmatprep.subr.bf16.mxu1 %v1384_v0 }
 0x151   :  { %1041 = vmatpush3.bf16.msra.mxu1 %v1155_v51 }
 0x152   :  { %1042 = vmatprep.subr.bf16.mxu1 %v1384_v0 }
 0x155   :  { %1043 = vmatpush3.bf16.msra.mxu1 %v1156_v63 }
 0x156   :  { %1044 = vmatprep.subr.bf16.mxu1 %v1384_v0 }
 0x159   :  { %1045 = vmatpush3.bf16.msra.mxu1 %v1157_v1 }
 0x15a   :  { %1046 = vmatprep.subr.bf16.mxu1 %v1384_v0 }
 0x15d   :  { %1047 = vmatpush3.bf16.msra.mxu1 %v1158_v2  ;;  %v782_v2 = vrot.slane %v1503_v33, 6 }
 0x15e   :  { %1048 = vmatprep.subr.bf16.mxu1 %v1384_v0 }
 0x161   :  { %1049 = vmatpush3.bf16.msra.mxu1 %v1159_v3 }
 0x162   :  { %1050 = vmatprep.subr.bf16.mxu1 %v1384_v0 }
 0x165   :  { %1051 = vmatpush3.bf16.msra.mxu1 %v1160_v4 }
 0x166   :  { %1052 = vmatprep.subr.bf16.mxu1 %v1384_v0 }
 0x169   :  { %1053 = vmatpush3.bf16.msra.mxu1 %v1161_v5 }
 0x16a   :  { %1078 = vmatprep.subr.bf16.mxu1 %v1384_v0 }
 0x20c   :  { %v361_v55 = vpop.f32.mrf.mxu1 }
 0x20d   :  { %v362_v56 = vadd.f32 %v361_v55, %v278_v54  ;;  %v667_v54 = vrot.slane %v1503_v33, 5 }
 0x20e   :  { %v1036_v57 = vpop.f32.mrf.mxu1 }
 0x20f   :  { %vm367_vm2 = vcmp.gt.f32.partialorder %v362_v56, 0.0  ;;  %v368_v58 = vmul.f32 0.01, %v362_v56  ;;  %v669_v55 = vunpack.c.l.bf16 %v667_v54 }
 0x210   :  { %v364_v59 = vpop.f32.mrf.mxu1 }
 0x211   :  { %v369_v60 = vsel %vm367_vm2, %v362_v56, %v368_v58  ;;  %v673_v56 = vrot.slane %v669_v55, %v1507_v35 }
 0x212   :  { %v370_v61 = vpack.c.bf16 %v369_v60, %v369_v60  ;;  %v1037_v62 = vpop.f32.mrf.mxu1 }
 0x214   :  { %522 = vmatmul.mubr.bf16.vlgmr.msra.gmra.mxu0 %v370_v61 }
 0x215   :  { %1074 = vmatprep.mubr.msk.bf16.mxu0 %vm1385_vm0, %v1384_v0  ;;  %1059 = vmatpush3.bf16.msra.mxu0 %v1162_v6 }
 0x216   :  { %1060 = vmatprep.subr.bf16.mxu0 %v1384_v0 }
 0x219   :  { %1061 = vmatpush3.bf16.msra.mxu0 %v1163_v7 }
 0x21a   :  { %1062 = vmatprep.subr.bf16.mxu0 %v1384_v0 }
 0x21d   :  { %1063 = vmatpush3.bf16.msra.mxu0 %v1164_v8 }
 0x21e   :  { %1064 = vmatprep.subr.bf16.mxu0 %v1384_v0 }
 0x221   :  { %1065 = vmatpush3.bf16.msra.mxu0 %v1165_v9 }
 0x222   :  { %1066 = vmatprep.subr.bf16.mxu0 %v1384_v0 }
 0x225   :  { %1067 = vmatpush3.bf16.msra.mxu0 %v1166_v10 }
 0x226   :  { %1068 = vmatprep.subr.bf16.mxu0 %v1384_v0 }
 0x229   :  { %1069 = vmatpush3.bf16.msra.mxu0 %v1167_v11 }
 0x22a   :  { %1070 = vmatprep.subr.bf16.mxu0 %v1384_v0 }
 0x22d   :  { %1071 = vmatpush3.bf16.msra.mxu0 %v1168_v31 }
 0x22e   :  { %1072 = vmatprep.subr.bf16.mxu0 %v1384_v0 }
 0x231   :  { %1073 = vmatpush3.bf16.msra.mxu0 %v1169_v34 }
 0x2d4   :  { %v523_v16 = vpop.f32.mrf.mxu0 }
 0x2d5   :  { %v524_v17 = vadd.f32 %v523_v16, %v404_v15 }
 0x2d6   :  { %v525_v18 = vpop.f32.mrf.mxu0 }
 0x2d7   :  { %v530_v19 = vmul.f32 1.442695, %v524_v17  ;;  %v526_v27 = vadd.f32 %v525_v18, %v408_v24 }
 0x2d8   :  { %v527_v20 = vpop.f32.mrf.mxu0 }
 0x2d9   :  { %1178 = vpow2.f32 %v530_v19 }
 0x2da   :  { %v528_v21 = vpop.f32.mrf.mxu0 }
 0x2e6   :  { %v1179_v26 = vpop.eup %1178 }
 0x2e7   :  { %v533_v28 = vmul.f32 %v1179_v26, %v532_v25 }
 0x2e9   :  { %v534_v29 = vadd.f32 %v533_v28, %v526_v27 }
 0x2eb   :  { %v535_v30 = vpack.c.bf16 %v534_v29, %v534_v29 }
 0x2ed   :  { %1055 = vmatmul.mubr.bf16.vlgmr.msra.gmra.mxu1 %v535_v30 }
 0x2ee   :  { %1094 = vmatprep.mubr.msk.bf16.mxu1 %vm1385_vm0, %v1384_v0  ;;  %1079 = vmatpush3.bf16.msra.mxu1 %v1170_v32 }
 0x2ef   :  { %1080 = vmatprep.subr.bf16.mxu1 %v1384_v0 }
 0x2f2   :  { %1081 = vmatpush3.bf16.msra.mxu1 %v1171_v36 }
 0x2f3   :  { %1082 = vmatprep.subr.bf16.mxu1 %v1384_v0 }
 0x2f6   :  { %1083 = vmatpush3.bf16.msra.mxu1 %v1172_v37 }
 0x2f7   :  { %1084 = vmatprep.subr.bf16.mxu1 %v1384_v0 }
 0x2fa   :  { %1085 = vmatpush3.bf16.msra.mxu1 %v1173_v38 }
 0x2fb   :  { %1086 = vmatprep.subr.bf16.mxu1 %v1384_v0 }
 0x2fe   :  { %1087 = vmatpush3.bf16.msra.mxu1 %v1174_v39 }
 0x2ff   :  { %1088 = vmatprep.subr.bf16.mxu1 %v1384_v0 }
 0x302   :  { %1089 = vmatpush3.bf16.msra.mxu1 %v1175_v40 }
 0x303   :  { %1090 = vmatprep.subr.bf16.mxu1 %v1384_v0 }
 0x306   :  { %1091 = vmatpush3.bf16.msra.mxu1 %v1176_v52 }
 0x307   :  { %1092 = vmatprep.subr.bf16.mxu1 %v1384_v0  ;;  %v784_v0 = vunpack.c.l.bf16 %v782_v2 }
 0x309   :  { %v788_v3 = vrot.slane %v784_v0, %v1507_v35 }
 0x30a   :  { %1093 = vmatpush3.bf16.msra.mxu1 %v1177_v53 }
 0x3ad   :  { %v641_v44 = vpop.f32.mrf.mxu1 }
 0x3ae   :  { %v642_v45 = vadd.f32 %v641_v44, %v558_v43 }
 0x3af   :  { %v1056_v46 = vpop.f32.mrf.mxu1 }
 0x3b0   :  { %vm647_vm3 = vcmp.gt.f32.partialorder %v642_v45, 0.0  ;;  %v648_v47 = vmul.f32 0.01, %v642_v45 }
 0x3b1   :  { %v644_v48 = vpop.f32.mrf.mxu1 }
 0x3b2   :  { %v649_v49 = vsel %vm647_vm3, %v642_v45, %v648_v47 }
 0x3b3   :  { %v650_v50 = vpack.c.bf16 %v649_v49, %v649_v49  ;;  %v1057_v51 = vpop.f32.mrf.mxu1 }
 0x3b5   :  { %1075 = vmatmul.mubr.bf16.vlgmr.msra.gmra.mxu0 %v650_v50 }
 0x475   :  { %v756_v57 = vpop.f32.mrf.mxu0 }
 0x476   :  { %v757_v58 = vadd.f32 %v756_v57, %v673_v56 }
 0x477   :  { %v1076_v59 = vpop.f32.mrf.mxu0 }
 0x478   :  { %vm762_vm4 = vcmp.gt.f32.partialorder %v757_v58, 0.0  ;;  %v763_v60 = vmul.f32 0.01, %v757_v58 }
 0x479   :  { %v759_v61 = vpop.f32.mrf.mxu0 }
 0x47a   :  { %v764_v62 = vsel %vm762_vm4, %v757_v58, %v763_v60 }
 0x47b   :  { %v765_v63 = vpack.c.bf16 %v764_v62, %v764_v62  ;;  %v1077_v1 = vpop.f32.mrf.mxu0 }
 0x47d   :  { %1095 = vmatmul.mubr.bf16.vlgmr.msra.gmra.mxu1 %v765_v63 }
 0x53d   :  { %v871_v4 = vpop.f32.mrf.mxu1 }
 0x53e   :  { %v872_v5 = vadd.f32 %v871_v4, %v788_v3 }
 0x53f   :  { %v1096_v6 = vpop.f32.mrf.mxu1 }
 0x540   :  { %877 = vst [vmem:[#allocation16] sm:$0xff] %v872_v5 }
 0x541   :  { %v874_v7 = vpop.f32.mrf.mxu1 }
 0x542   :  { %1351 = shalt.err (!%p1348_p2)
}
 0x543   :  { %887 = dma.vmem_to_hbm [thread:$0]  %s885_s19, 128, %s1564_s9, [#allocation4]   ;;  %v1097_v33 = vpop.f32.mrf.mxu1 }
 0x544   :  { %1370 = dma.done.wait [#allocation4], 128  }
 0x545   :  { %1371 = vsyncadd [#allocation4], 4294967168 }
 0x546   :  { %891 = vsyncpa [#allocation3], 1 }
 0x547   :  { %892 = vsyncpa [#allocation6], 1 }
 0x548   :  { %893 = vsyncpa [#allocation9], 1 }
 0x549   :  { %894 = vsyncpa [#allocation12], 1 }
 0x54a   :  { %895 = vsyncpa [#allocation15], 1 }
 0x54b   :  { %896 = vsyncpa [#allocation4], 1 }

</bundles_post_ra>
